<compile_context>
chip_gen: v7x
topology: tpu7x:2x2x1
jax: 0.10.0
libtpu: 0.0.40
codegen_flags: <defaults>
</compile_context>

<pallas_src>
import functools
import math

import jax
import jax.numpy as jnp
from jax.experimental import pallas as pl
from jax.experimental.pallas import tpu as pltpu


# ---------------------------------------------------------------------------
# In-kernel helpers
# ---------------------------------------------------------------------------

def _erf(x):
    # Abramowitz & Stegun 7.1.26 rational approximation (max abs err ~1.5e-7,
    # i.e. fp32-accurate).  Used because lax.erf has no guaranteed Mosaic
    # lowering; built only from exp/abs/where which lower cleanly.
    p = 0.3275911
    a1, a2, a3, a4, a5 = (0.254829592, -0.284496736, 1.421413741,
                          -1.453152027, 1.061405429)
    ax = jnp.abs(x)
    t = 1.0 / (1.0 + p * ax)
    poly = ((((a5 * t + a4) * t + a3) * t + a2) * t + a1) * t
    y = 1.0 - poly * jnp.exp(-ax * ax)
    return jnp.where(x >= 0, y, -y)


def _gelu(x):
    # exact (erf-based) gelu, as used by the original ESM repo
    return x * 0.5 * (1.0 + _erf(x * 0.7071067811865476))


# ---------------------------------------------------------------------------
# Fused encoder kernel: grid = (num_layers,), hidden state resident in out_ref
# ---------------------------------------------------------------------------

def _esm_encoder_kernel(
    x_ref, cos_ref, sin_ref, rot_ref,
    ln1_g_ref, ln1_b_ref, wqkv_ref, bqkv_ref, wo_ref, bo_ref,
    ln2_g_ref, ln2_b_ref, wi_ref, bi_ref, wo2_ref, bo2_ref,
    fln_g_ref, fln_b_ref,
    out_ref,
    *, batch, seq, hidden, num_heads, eps):
    layer = pl.program_id(0)
    n_layers = pl.num_programs(0)
    d = hidden // num_heads
    bs = batch * seq

    @pl.when(layer == 0)
    def _init():
        out_ref[...] = x_ref[...]

    h = out_ref[...]                                   # (B*S, H), fp32

    def layer_norm(x, g, b):
        mu = jnp.mean(x, axis=-1, keepdims=True)
        xc = x - mu
        var = jnp.mean(xc * xc, axis=-1, keepdims=True)
        return xc * jax.lax.rsqrt(var + eps) * g + b

    # ---------------- attention block (pre-LN) ----------------
    x_ln = layer_norm(h, ln1_g_ref[0], ln1_b_ref[0])
    qkv = (jnp.dot(x_ln, wqkv_ref[0], preferred_element_type=jnp.float32)
           + bqkv_ref[0])                              # (B*S, 3H)

    scale = d ** -0.5
    q2d = qkv[:, :hidden] * scale                      # scale before rotary
    k2d = qkv[:, hidden:2 * hidden]
    v2d = qkv[:, 2 * hidden:]

    # rotary: x*cos + rotate_half(x)*sin, with rotate_half expressed as a
    # block-diagonal signed permutation matmul -> runs on the MXU.
    cos = cos_ref[...]
    sin = sin_ref[...]
    rot = rot_ref[...]
    q2d = q2d * cos + jnp.dot(q2d, rot, preferred_element_type=jnp.float32) * sin
    k2d = k2d * cos + jnp.dot(k2d, rot, preferred_element_type=jnp.float32) * sin

    # all-heads attention in one kernel body (static unroll over few heads);
    # softmax_scale already folded into q.
    ctx_parts = []
    for hh in range(num_heads):
        cols = slice(hh * d, (hh + 1) * d)
        qh = q2d[:, cols].reshape(batch, seq, d)
        kh = k2d[:, cols].reshape(batch, seq, d)
        vh = v2d[:, cols].reshape(batch, seq, d)
        s = jnp.einsum('bqd,bkd->bqk', qh, kh,
                       preferred_element_type=jnp.float32)
        m = jnp.max(s, axis=-1, keepdims=True)
        p = jnp.exp(s - m)
        denom = jnp.sum(p, axis=-1, keepdims=True)
        inv = pl.reciprocal(denom, approx=True)        # EUP slot
        inv = inv * (2.0 - denom * inv)                # Newton step -> fp32 acc.
        ctx_h = jnp.einsum('bqk,bkd->bqd', p, vh,
                           preferred_element_type=jnp.float32) * inv
        ctx_parts.append(ctx_h.reshape(bs, d))
    ctx = jnp.concatenate(ctx_parts, axis=-1)          # (B*S, H)

    attn_out = (jnp.dot(ctx, wo_ref[0], preferred_element_type=jnp.float32)
                + bo_ref[0])
    h = h + attn_out                                   # residual (dropout=0)

    # ---------------- feed-forward block (pre-LN) ----------------
    x_ln2 = layer_norm(h, ln2_g_ref[0], ln2_b_ref[0])
    inter = _gelu(jnp.dot(x_ln2, wi_ref[0], preferred_element_type=jnp.float32)
                  + bi_ref[0])
    ffn_out = (jnp.dot(inter, wo2_ref[0], preferred_element_type=jnp.float32)
               + bo2_ref[0])
    h = h + ffn_out                                    # residual (dropout=0)

    out_ref[...] = h                                   # carry to next layer

    @pl.when(layer == n_layers - 1)
    def _final():
        out_ref[...] = layer_norm(h, fln_g_ref[...], fln_b_ref[...])


# ---------------------------------------------------------------------------
# Host-side rotary tables (broadcast to the flattened (B*S, H) layout)
# ---------------------------------------------------------------------------

def _rope_tables(batch, seq, hidden, num_heads, dtype=jnp.float32):
    d = hidden // num_heads
    inv_freq = 1.0 / (10000.0 ** (jnp.arange(0, d, 2, dtype=jnp.float32) / d))
    t = jnp.arange(seq, dtype=jnp.float32)
    freqs = jnp.outer(t, inv_freq)                     # (S, D/2)
    emb = jnp.concatenate((freqs, freqs), axis=-1)     # (S, D)
    cos = jnp.cos(emb)
    sin = jnp.sin(emb)
    cos_bs = jnp.tile(jnp.tile(cos, (1, num_heads)), (batch, 1)).astype(dtype)
    sin_bs = jnp.tile(jnp.tile(sin, (1, num_heads)), (batch, 1)).astype(dtype)
    # rotate_half(x) == x @ R, with R a signed (D, D) permutation;
    # block-diagonal over heads gives the (H, H) matrix used in-kernel.
    half = d // 2
    r = jnp.zeros((d, d), dtype=dtype)
    r = r.at[half:, :half].set(-jnp.eye(half, dtype=dtype))
    r = r.at[:half, half:].set(jnp.eye(half, dtype=dtype))
    rot = jnp.kron(jnp.eye(num_heads, dtype=dtype), r)  # (H, H)
    return cos_bs, sin_bs, rot


# ---------------------------------------------------------------------------
# Wrapper
# ---------------------------------------------------------------------------

def esm_encoder_forward(hidden_states, params, *, num_heads, eps=1e-12):
    b, s, h = hidden_states.shape
    n_layers = params["wqkv"].shape[0]
    inter = params["wi"].shape[-1]
    bs = b * s

    cos_bs, sin_bs, rot = _rope_tables(b, s, h, num_heads, hidden_states.dtype)
    x2d = hidden_states.reshape(bs, h)

    def full2d(shape):
        return pl.BlockSpec(shape, lambda l: (0, 0))

    def per_layer(shape):
        return pl.BlockSpec((1,) + shape, lambda l: (l, 0, 0))

    kernel = functools.partial(
        _esm_encoder_kernel, batch=b, seq=s, hidden=h,
        num_heads=num_heads, eps=eps)

    out2d = pl.pallas_call(
        kernel,
        out_shape=jax.ShapeDtypeStruct((bs, h), hidden_states.dtype),
        grid=(n_layers,),
        in_specs=[
            full2d((bs, h)),         # x (flattened hidden states)
            full2d((bs, h)),         # cos table
            full2d((bs, h)),         # sin table
            full2d((h, h)),          # rotate_half matrix
            per_layer((1, h)),       # attn LN gamma
            per_layer((1, h)),       # attn LN beta
            per_layer((h, 3 * h)),   # fused Wqkv
            per_layer((1, 3 * h)),   # fused bqkv
            per_layer((h, h)),       # Wo   (EsmSelfOutput.dense)
            per_layer((1, h)),       # bo
            per_layer((1, h)),       # ffn LN gamma
            per_layer((1, h)),       # ffn LN beta
            per_layer((h, inter)),   # Wi   (EsmIntermediate.dense)
            per_layer((1, inter)),   # bi
            per_layer((inter, h)),   # Wo2  (EsmOutput.dense)
            per_layer((1, h)),       # bo2
            full2d((1, h)),          # final LN gamma
            full2d((1, h)),          # final LN beta
        ],
        out_specs=full2d((bs, h)),
        compiler_params=pltpu.CompilerParams(
            dimension_semantics=("arbitrary",)),
    )(x2d, cos_bs, sin_bs, rot,
      params["ln1_g"], params["ln1_b"], params["wqkv"], params["bqkv"],
      params["wo"], params["bo"], params["ln2_g"], params["ln2_b"],
      params["wi"], params["bi"], params["wo2"], params["bo2"],
      params["fln_g"], params["fln_b"])

    return out2d.reshape(b, s, h)


# ---------------------------------------------------------------------------
# Pure-JAX reference (mirrors the PyTorch EsmEncoder math)
# ---------------------------------------------------------------------------

def reference_forward(hidden_states, params, *, num_heads, eps=1e-12):
    b, s, h = hidden_states.shape
    d = h // num_heads
    n_layers = params["wqkv"].shape[0]

    def layer_norm(x, g, beta):
        mu = jnp.mean(x, axis=-1, keepdims=True)
        var = jnp.mean((x - mu) ** 2, axis=-1, keepdims=True)
        return (x - mu) * jax.lax.rsqrt(var + eps) * g + beta

    inv_freq = 1.0 / (10000.0 ** (jnp.arange(0, d, 2, dtype=jnp.float32) / d))
    t = jnp.arange(s, dtype=jnp.float32)
    emb = jnp.concatenate((jnp.outer(t, inv_freq),) * 2, axis=-1)
    cos = jnp.cos(emb)[None, None]
    sin = jnp.sin(emb)[None, None]

    def rotate_half(x):
        x1, x2 = jnp.split(x, 2, axis=-1)
        return jnp.concatenate((-x2, x1), axis=-1)

    def rope(x):
        return x * cos + rotate_half(x) * sin

    hs = hidden_states
    for i in range(n_layers):
        ln = layer_norm(hs, params["ln1_g"][i, 0], params["ln1_b"][i, 0])
        qkv = ln.reshape(b * s, h) @ params["wqkv"][i] + params["bqkv"][i, 0]

        def heads(x):
            return x.reshape(b, s, num_heads, d).transpose(0, 2, 1, 3)

        q = heads(qkv[:, :h]) * d ** -0.5
        k = heads(qkv[:, h:2 * h])
        v = heads(qkv[:, 2 * h:])
        q, k = rope(q), rope(k)
        scores = jnp.einsum('bhqd,bhkd->bhqk', q, k)
        probs = jax.nn.softmax(scores, axis=-1)
        ctx = jnp.einsum('bhqk,bhkd->bhqd', probs, v)
        ctx = ctx.transpose(0, 2, 1, 3).reshape(b * s, h)
        attn = ctx @ params["wo"][i] + params["bo"][i, 0]
        hs = hs + attn.reshape(b, s, h)

        ln2 = layer_norm(hs, params["ln2_g"][i, 0], params["ln2_b"][i, 0])
        x = ln2.reshape(b * s, h) @ params["wi"][i] + params["bi"][i, 0]
        x = x * 0.5 * (1.0 + jax.lax.erf(x / math.sqrt(2.0)))
        ffn = x @ params["wo2"][i] + params["bo2"][i, 0]
        hs = hs + ffn.reshape(b, s, h)

    return layer_norm(hs, params["fln_g"][0], params["fln_b"][0])


# ---------------------------------------------------------------------------
# Main
# ---------------------------------------------------------------------------

if __name__ == "__main__":
    B, S, H, NUM_HEADS, INTER, LAYERS = 2, 8, 32, 4, 64, 2

    key = jax.random.PRNGKey(0)
    keys = jax.random.split(key, 16)

    def normal(k, shape, scale=1.0):
        return jax.random.normal(k, shape, dtype=jnp.float32) * scale

    hidden_states = normal(keys[0], (B, S, H))

    w_scale = 1.0 / math.sqrt(H)
    params = {
        "ln1_g": 1.0 + 0.1 * normal(keys[1], (LAYERS, 1, H)),
        "ln1_b": 0.1 * normal(keys[2], (LAYERS, 1, H)),
        "wqkv":  normal(keys[3], (LAYERS, H, 3 * H), w_scale),
        "bqkv":  0.02 * normal(keys[4], (LAYERS, 1, 3 * H)),
        "wo":    normal(keys[5], (LAYERS, H, H), w_scale),
        "bo":    0.02 * normal(keys[6], (LAYERS, 1, H)),
        "ln2_g": 1.0 + 0.1 * normal(keys[7], (LAYERS, 1, H)),
        "ln2_b": 0.1 * normal(keys[8], (LAYERS, 1, H)),
        "wi":    normal(keys[9], (LAYERS, H, INTER), w_scale),
        "bi":    0.02 * normal(keys[10], (LAYERS, 1, INTER)),
        "wo2":   normal(keys[11], (LAYERS, INTER, H), 1.0 / math.sqrt(INTER)),
        "bo2":   0.02 * normal(keys[12], (LAYERS, 1, H)),
        "fln_g": 1.0 + 0.1 * normal(keys[13], (1, H)),
        "fln_b": 0.1 * normal(keys[14], (1, H)),
    }

    fwd = jax.jit(functools.partial(esm_encoder_forward, num_heads=NUM_HEADS))
    out = jax.block_until_ready(fwd(hidden_states, params))

    ref = reference_forward(hidden_states, params, num_heads=NUM_HEADS)
    assert out.shape == (B, S, H)
    assert jnp.allclose(out, ref, atol=1e-4, rtol=1e-4), (
        f"mismatch vs reference: max abs err {jnp.max(jnp.abs(out - ref))}")

    print("KERNEL_OK")
</pallas_src>

<mosaic_0001>
module attributes {stable_mosaic.version = 11 : i64} {
  func.func @_esm_encoder_kernel(%arg0: i32, %arg1: memref<16x32xf32, #tpu.memory_space<vmem>>, %arg2: memref<16x32xf32, #tpu.memory_space<vmem>>, %arg3: memref<16x32xf32, #tpu.memory_space<vmem>>, %arg4: memref<32x32xf32, #tpu.memory_space<vmem>>, %arg5: memref<1x1x32xf32, #tpu.memory_space<vmem>>, %arg6: memref<1x1x32xf32, #tpu.memory_space<vmem>>, %arg7: memref<1x32x96xf32, #tpu.memory_space<vmem>>, %arg8: memref<1x1x96xf32, #tpu.memory_space<vmem>>, %arg9: memref<1x32x32xf32, #tpu.memory_space<vmem>>, %arg10: memref<1x1x32xf32, #tpu.memory_space<vmem>>, %arg11: memref<1x1x32xf32, #tpu.memory_space<vmem>>, %arg12: memref<1x1x32xf32, #tpu.memory_space<vmem>>, %arg13: memref<1x32x64xf32, #tpu.memory_space<vmem>>, %arg14: memref<1x1x64xf32, #tpu.memory_space<vmem>>, %arg15: memref<1x64x32xf32, #tpu.memory_space<vmem>>, %arg16: memref<1x1x32xf32, #tpu.memory_space<vmem>>, %arg17: memref<1x32xf32, #tpu.memory_space<vmem>>, %arg18: memref<1x32xf32, #tpu.memory_space<vmem>>, %arg19: memref<16x32xf32, #tpu.memory_space<vmem>>) attributes {dimension_semantics = [#tpu.dimension_semantics<arbitrary>], iteration_bounds = array<i64: 2>, scalar_prefetch = 0 : i64, scratch_operands = 0 : i64, tpu.core_type = #tpu.core_type<tc>, window_params = [{pipeline_mode = #tpu.pipeline_mode<synchronous>, transform_indices = @transform_0, window_bounds = array<i64: 16, 32>}, {pipeline_mode = #tpu.pipeline_mode<synchronous>, transform_indices = @transform_1, window_bounds = array<i64: 16, 32>}, {pipeline_mode = #tpu.pipeline_mode<synchronous>, transform_indices = @transform_2, window_bounds = array<i64: 16, 32>}, {pipeline_mode = #tpu.pipeline_mode<synchronous>, transform_indices = @transform_3, window_bounds = array<i64: 32, 32>}, {transform_indices = @transform_4, window_bounds = array<i64: 1, 1, 32>}, {transform_indices = @transform_5, window_bounds = array<i64: 1, 1, 32>}, {transform_indices = @transform_6, window_bounds = array<i64: 1, 32, 96>}, {transform_indices = @transform_7, window_bounds = array<i64: 1, 1, 96>}, {transform_indices = @transform_8, window_bounds = array<i64: 1, 32, 32>}, {transform_indices = @transform_9, window_bounds = array<i64: 1, 1, 32>}, {transform_indices = @transform_10, window_bounds = array<i64: 1, 1, 32>}, {transform_indices = @transform_11, window_bounds = array<i64: 1, 1, 32>}, {transform_indices = @transform_12, window_bounds = array<i64: 1, 32, 64>}, {transform_indices = @transform_13, window_bounds = array<i64: 1, 1, 64>}, {transform_indices = @transform_14, window_bounds = array<i64: 1, 64, 32>}, {transform_indices = @transform_15, window_bounds = array<i64: 1, 1, 32>}, {pipeline_mode = #tpu.pipeline_mode<synchronous>, transform_indices = @transform_16, window_bounds = array<i64: 1, 32>}, {pipeline_mode = #tpu.pipeline_mode<synchronous>, transform_indices = @transform_17, window_bounds = array<i64: 1, 32>}, {pipeline_mode = #tpu.pipeline_mode<synchronous>, transform_indices = @transform_18, window_bounds = array<i64: 16, 32>}]} {
    %c0_i32 = arith.constant 0 : i32
    %0 = arith.cmpi eq, %arg0, %c0_i32 : i32
    %1 = arith.extui %0 : i1 to i32
    %c0_i32_0 = arith.constant 0 : i32
    %2 = arith.cmpi ne, %1, %c0_i32_0 : i32
    scf.if %2 {
      %c0_98 = arith.constant 0 : index
      %c0_99 = arith.constant 0 : index
      %235 = vector.load %arg1[%c0_98, %c0_99] : memref<16x32xf32, #tpu.memory_space<vmem>>, vector<16x32xf32>
      %c0_100 = arith.constant 0 : index
      %c0_101 = arith.constant 0 : index
      %236 = vector.load %arg19[%c0_100, %c0_101] : memref<16x32xf32, #tpu.memory_space<vmem>>, vector<16x32xf32>
      tpu.vector_store %arg19[%c0_100, %c0_101], %235 {strides = array<i32>} : memref<16x32xf32, #tpu.memory_space<vmem>>, vector<16x32xf32>,
    } else {
    }
    %c0 = arith.constant 0 : index
    %c0_1 = arith.constant 0 : index
    %3 = vector.load %arg19[%c0, %c0_1] : memref<16x32xf32, #tpu.memory_space<vmem>>, vector<16x32xf32>
    %c0_2 = arith.constant 0 : index
    %c0_3 = arith.constant 0 : index
    %c0_4 = arith.constant 0 : index
    %4 = vector.load %arg5[%c0_2, %c0_3, %c0_4] : memref<1x1x32xf32, #tpu.memory_space<vmem>>, vector<1x1x32xf32>
    %5 = vector.shape_cast %4 : vector<1x1x32xf32> to vector<1x32xf32>
    %c0_5 = arith.constant 0 : index
    %c0_6 = arith.constant 0 : index
    %c0_7 = arith.constant 0 : index
    %6 = vector.load %arg6[%c0_5, %c0_6, %c0_7] : memref<1x1x32xf32, #tpu.memory_space<vmem>>, vector<1x1x32xf32>
    %7 = vector.shape_cast %6 : vector<1x1x32xf32> to vector<1x32xf32>
    %cst = arith.constant dense<0.000000e+00> : vector<16xf32>
    %8 = vector.multi_reduction <add>, %3, %cst [1] : vector<16x32xf32> to vector<16xf32>
    %9 = vector.shape_cast %8 : vector<16xf32> to vector<16x1xf32>
    %cst_8 = arith.constant 3.200000e+01 : f32
    %10 = vector.broadcast %cst_8 : f32 to vector<16x1xf32>
    %11 = arith.divf %9, %10 : vector<16x1xf32>
    %12 = vector.broadcast %11 : vector<16x1xf32> to vector<16x32xf32>
    %13 = arith.subf %3, %12 : vector<16x32xf32>
    %14 = arith.mulf %13, %13 : vector<16x32xf32>
    %cst_9 = arith.constant dense<0.000000e+00> : vector<16xf32>
    %15 = vector.multi_reduction <add>, %14, %cst_9 [1] : vector<16x32xf32> to vector<16xf32>
    %16 = vector.shape_cast %15 : vector<16xf32> to vector<16x1xf32>
    %cst_10 = arith.constant 3.200000e+01 : f32
    %17 = vector.broadcast %cst_10 : f32 to vector<16x1xf32>
    %18 = arith.divf %16, %17 : vector<16x1xf32>
    %cst_11 = arith.constant 9.99999996E-13 : f32
    %19 = vector.broadcast %cst_11 : f32 to vector<16x1xf32>
    %20 = arith.addf %18, %19 : vector<16x1xf32>
    %21 = math.rsqrt %20 : vector<16x1xf32>
    %22 = vector.broadcast %21 : vector<16x1xf32> to vector<16x32xf32>
    %23 = arith.mulf %13, %22 : vector<16x32xf32>
    %24 = vector.broadcast %5 : vector<1x32xf32> to vector<16x32xf32>
    %25 = arith.mulf %23, %24 : vector<16x32xf32>
    %26 = vector.broadcast %7 : vector<1x32xf32> to vector<16x32xf32>
    %27 = arith.addf %25, %26 : vector<16x32xf32>
    %c0_12 = arith.constant 0 : index
    %c0_13 = arith.constant 0 : index
    %c0_14 = arith.constant 0 : index
    %28 = vector.load %arg7[%c0_12, %c0_13, %c0_14] : memref<1x32x96xf32, #tpu.memory_space<vmem>>, vector<1x32x96xf32>
    %29 = vector.shape_cast %28 : vector<1x32x96xf32> to vector<32x96xf32>
    %cst_15 = arith.constant dense<0.000000e+00> : vector<16x96xf32>
    %30 = tpu.matmul %27, %29, %cst_15 {dimension_numbers = #tpu.dot_dimension_numbers<[1], [0], [0], [1], [0, 0, 1, 1], [], []>} : vector<16x32xf32>, vector<32x96xf32>, vector<16x96xf32> -> vector<16x96xf32>
    %c0_16 = arith.constant 0 : index
    %c0_17 = arith.constant 0 : index
    %c0_18 = arith.constant 0 : index
    %31 = vector.load %arg8[%c0_16, %c0_17, %c0_18] : memref<1x1x96xf32, #tpu.memory_space<vmem>>, vector<1x1x96xf32>
    %32 = vector.shape_cast %31 : vector<1x1x96xf32> to vector<1x96xf32>
    %33 = vector.broadcast %32 : vector<1x96xf32> to vector<16x96xf32>
    %34 = arith.addf %30, %33 : vector<16x96xf32>
    %35 = vector.extract_strided_slice %34 {offsets = [0, 0], sizes = [16, 32], strides = [1, 1]} : vector<16x96xf32> to vector<16x32xf32>
    %cst_19 = arith.constant 0.353553385 : f32
    %36 = vector.broadcast %cst_19 : f32 to vector<16x32xf32>
    %37 = arith.mulf %35, %36 : vector<16x32xf32>
    %38 = vector.extract_strided_slice %34 {offsets = [0, 32], sizes = [16, 32], strides = [1, 1]} : vector<16x96xf32> to vector<16x32xf32>
    %39 = vector.extract_strided_slice %34 {offsets = [0, 64], sizes = [16, 32], strides = [1, 1]} : vector<16x96xf32> to vector<16x32xf32>
    %c0_20 = arith.constant 0 : index
    %c0_21 = arith.constant 0 : index
    %40 = vector.load %arg2[%c0_20, %c0_21] : memref<16x32xf32, #tpu.memory_space<vmem>>, vector<16x32xf32>
    %c0_22 = arith.constant 0 : index
    %c0_23 = arith.constant 0 : index
    %41 = vector.load %arg3[%c0_22, %c0_23] : memref<16x32xf32, #tpu.memory_space<vmem>>, vector<16x32xf32>
    %c0_24 = arith.constant 0 : index
    %c0_25 = arith.constant 0 : index
    %42 = vector.load %arg4[%c0_24, %c0_25] : memref<32x32xf32, #tpu.memory_space<vmem>>, vector<32x32xf32>
    %43 = arith.mulf %37, %40 : vector<16x32xf32>
    %cst_26 = arith.constant dense<0.000000e+00> : vector<16x32xf32>
    %44 = tpu.matmul %37, %42, %cst_26 {dimension_numbers = #tpu.dot_dimension_numbers<[1], [0], [0], [1], [0, 0, 1, 1], [], []>} : vector<16x32xf32>, vector<32x32xf32>, vector<16x32xf32> -> vector<16x32xf32>
    %45 = arith.mulf %44, %41 : vector<16x32xf32>
    %46 = arith.addf %43, %45 : vector<16x32xf32>
    %47 = arith.mulf %38, %40 : vector<16x32xf32>
    %cst_27 = arith.constant dense<0.000000e+00> : vector<16x32xf32>
    %48 = tpu.matmul %38, %42, %cst_27 {dimension_numbers = #tpu.dot_dimension_numbers<[1], [0], [0], [1], [0, 0, 1, 1], [], []>} : vector<16x32xf32>, vector<32x32xf32>, vector<16x32xf32> -> vector<16x32xf32>
    %49 = arith.mulf %48, %41 : vector<16x32xf32>
    %50 = arith.addf %47, %49 : vector<16x32xf32>
    %51 = vector.extract_strided_slice %46 {offsets = [0, 0], sizes = [16, 8], strides = [1, 1]} : vector<16x32xf32> to vector<16x8xf32>
    %52 = vector.shape_cast %51 : vector<16x8xf32> to vector<2x8x8xf32>
    %53 = vector.extract_strided_slice %50 {offsets = [0, 0], sizes = [16, 8], strides = [1, 1]} : vector<16x32xf32> to vector<16x8xf32>
    %54 = vector.shape_cast %53 : vector<16x8xf32> to vector<2x8x8xf32>
    %55 = vector.extract_strided_slice %39 {offsets = [0, 0], sizes = [16, 8], strides = [1, 1]} : vector<16x32xf32> to vector<16x8xf32>
    %56 = vector.shape_cast %55 : vector<16x8xf32> to vector<2x8x8xf32>
    "tpu.trace_start"() <{level = 10 : i32, message = "bqd,bkd->bqk"}> : () -> ()
    %cst_28 = arith.constant dense<0.000000e+00> : vector<2x8x8xf32>
    %57 = tpu.matmul %52, %54, %cst_28 {dimension_numbers = #tpu.dot_dimension_numbers<[2], [2], [1], [1], [0, 0, 0, 1, 1, 1], [0], [0]>} : vector<2x8x8xf32>, vector<2x8x8xf32>, vector<2x8x8xf32> -> vector<2x8x8xf32>
    "tpu.trace_stop"() : () -> ()
    %cst_29 = arith.constant dense<0xFF800000> : vector<2x8xf32>
    %58 = vector.multi_reduction <maximumf>, %57, %cst_29 [2] : vector<2x8x8xf32> to vector<2x8xf32>
    %59 = vector.shape_cast %58 : vector<2x8xf32> to vector<2x8x1xf32>
    %60 = vector.broadcast %59 : vector<2x8x1xf32> to vector<2x8x8xf32>
    %61 = arith.subf %57, %60 : vector<2x8x8xf32>
    %62 = math.exp %61 : vector<2x8x8xf32>
    %cst_30 = arith.constant dense<0.000000e+00> : vector<2x8xf32>
    %63 = vector.multi_reduction <add>, %62, %cst_30 [2] : vector<2x8x8xf32> to vector<2x8xf32>
    %64 = vector.shape_cast %63 : vector<2x8xf32> to vector<2x8x1xf32>
    %65 = tpu.reciprocal %64 {approx = true} : vector<2x8x1xf32> -> vector<2x8x1xf32>
    %66 = arith.mulf %64, %65 : vector<2x8x1xf32>
    %cst_31 = arith.constant 2.000000e+00 : f32
    %67 = vector.broadcast %cst_31 : f32 to vector<2x8x1xf32>
    %68 = arith.subf %67, %66 : vector<2x8x1xf32>
    %69 = arith.mulf %65, %68 : vector<2x8x1xf32>
    "tpu.trace_start"() <{level = 10 : i32, message = "bqk,bkd->bqd"}> : () -> ()
    %cst_32 = arith.constant dense<0.000000e+00> : vector<2x8x8xf32>
    %70 = tpu.matmul %62, %56, %cst_32 {dimension_numbers = #tpu.dot_dimension_numbers<[2], [1], [1], [2], [0, 0, 0, 1, 1, 2], [0], [0]>} : vector<2x8x8xf32>, vector<2x8x8xf32>, vector<2x8x8xf32> -> vector<2x8x8xf32>
    "tpu.trace_stop"() : () -> ()
    %71 = vector.broadcast %69 : vector<2x8x1xf32> to vector<2x8x8xf32>
    %72 = arith.mulf %70, %71 : vector<2x8x8xf32>
    %73 = vector.shape_cast %72 : vector<2x8x8xf32> to vector<16x8xf32>
    %74 = vector.extract_strided_slice %46 {offsets = [0, 8], sizes = [16, 8], strides = [1, 1]} : vector<16x32xf32> to vector<16x8xf32>
    %75 = vector.shape_cast %74 : vector<16x8xf32> to vector<2x8x8xf32>
    %76 = vector.extract_strided_slice %50 {offsets = [0, 8], sizes = [16, 8], strides = [1, 1]} : vector<16x32xf32> to vector<16x8xf32>
    %77 = vector.shape_cast %76 : vector<16x8xf32> to vector<2x8x8xf32>
    %78 = vector.extract_strided_slice %39 {offsets = [0, 8], sizes = [16, 8], strides = [1, 1]} : vector<16x32xf32> to vector<16x8xf32>
    %79 = vector.shape_cast %78 : vector<16x8xf32> to vector<2x8x8xf32>
    "tpu.trace_start"() <{level = 10 : i32, message = "bqd,bkd->bqk"}> : () -> ()
    %cst_33 = arith.constant dense<0.000000e+00> : vector<2x8x8xf32>
    %80 = tpu.matmul %75, %77, %cst_33 {dimension_numbers = #tpu.dot_dimension_numbers<[2], [2], [1], [1], [0, 0, 0, 1, 1, 1], [0], [0]>} : vector<2x8x8xf32>, vector<2x8x8xf32>, vector<2x8x8xf32> -> vector<2x8x8xf32>
    "tpu.trace_stop"() : () -> ()
    %cst_34 = arith.constant dense<0xFF800000> : vector<2x8xf32>
    %81 = vector.multi_reduction <maximumf>, %80, %cst_34 [2] : vector<2x8x8xf32> to vector<2x8xf32>
    %82 = vector.shape_cast %81 : vector<2x8xf32> to vector<2x8x1xf32>
    %83 = vector.broadcast %82 : vector<2x8x1xf32> to vector<2x8x8xf32>
    %84 = arith.subf %80, %83 : vector<2x8x8xf32>
    %85 = math.exp %84 : vector<2x8x8xf32>
    %cst_35 = arith.constant dense<0.000000e+00> : vector<2x8xf32>
    %86 = vector.multi_reduction <add>, %85, %cst_35 [2] : vector<2x8x8xf32> to vector<2x8xf32>
    %87 = vector.shape_cast %86 : vector<2x8xf32> to vector<2x8x1xf32>
    %88 = tpu.reciprocal %87 {approx = true} : vector<2x8x1xf32> -> vector<2x8x1xf32>
    %89 = arith.mulf %87, %88 : vector<2x8x1xf32>
    %cst_36 = arith.constant 2.000000e+00 : f32
    %90 = vector.broadcast %cst_36 : f32 to vector<2x8x1xf32>
    %91 = arith.subf %90, %89 : vector<2x8x1xf32>
    %92 = arith.mulf %88, %91 : vector<2x8x1xf32>
    "tpu.trace_start"() <{level = 10 : i32, message = "bqk,bkd->bqd"}> : () -> ()
    %cst_37 = arith.constant dense<0.000000e+00> : vector<2x8x8xf32>
    %93 = tpu.matmul %85, %79, %cst_37 {dimension_numbers = #tpu.dot_dimension_numbers<[2], [1], [1], [2], [0, 0, 0, 1, 1, 2], [0], [0]>} : vector<2x8x8xf32>, vector<2x8x8xf32>, vector<2x8x8xf32> -> vector<2x8x8xf32>
    "tpu.trace_stop"() : () -> ()
    %94 = vector.broadcast %92 : vector<2x8x1xf32> to vector<2x8x8xf32>
    %95 = arith.mulf %93, %94 : vector<2x8x8xf32>
    %96 = vector.shape_cast %95 : vector<2x8x8xf32> to vector<16x8xf32>
    %97 = vector.extract_strided_slice %46 {offsets = [0, 16], sizes = [16, 8], strides = [1, 1]} : vector<16x32xf32> to vector<16x8xf32>
    %98 = vector.shape_cast %97 : vector<16x8xf32> to vector<2x8x8xf32>
    %99 = vector.extract_strided_slice %50 {offsets = [0, 16], sizes = [16, 8], strides = [1, 1]} : vector<16x32xf32> to vector<16x8xf32>
    %100 = vector.shape_cast %99 : vector<16x8xf32> to vector<2x8x8xf32>
    %101 = vector.extract_strided_slice %39 {offsets = [0, 16], sizes = [16, 8], strides = [1, 1]} : vector<16x32xf32> to vector<16x8xf32>
    %102 = vector.shape_cast %101 : vector<16x8xf32> to vector<2x8x8xf32>
    "tpu.trace_start"() <{level = 10 : i32, message = "bqd,bkd->bqk"}> : () -> ()
    %cst_38 = arith.constant dense<0.000000e+00> : vector<2x8x8xf32>
    %103 = tpu.matmul %98, %100, %cst_38 {dimension_numbers = #tpu.dot_dimension_numbers<[2], [2], [1], [1], [0, 0, 0, 1, 1, 1], [0], [0]>} : vector<2x8x8xf32>, vector<2x8x8xf32>, vector<2x8x8xf32> -> vector<2x8x8xf32>
    "tpu.trace_stop"() : () -> ()
    %cst_39 = arith.constant dense<0xFF800000> : vector<2x8xf32>
    %104 = vector.multi_reduction <maximumf>, %103, %cst_39 [2] : vector<2x8x8xf32> to vector<2x8xf32>
    %105 = vector.shape_cast %104 : vector<2x8xf32> to vector<2x8x1xf32>
    %106 = vector.broadcast %105 : vector<2x8x1xf32> to vector<2x8x8xf32>
    %107 = arith.subf %103, %106 : vector<2x8x8xf32>
    %108 = math.exp %107 : vector<2x8x8xf32>
    %cst_40 = arith.constant dense<0.000000e+00> : vector<2x8xf32>
    %109 = vector.multi_reduction <add>, %108, %cst_40 [2] : vector<2x8x8xf32> to vector<2x8xf32>
    %110 = vector.shape_cast %109 : vector<2x8xf32> to vector<2x8x1xf32>
    %111 = tpu.reciprocal %110 {approx = true} : vector<2x8x1xf32> -> vector<2x8x1xf32>
    %112 = arith.mulf %110, %111 : vector<2x8x1xf32>
    %cst_41 = arith.constant 2.000000e+00 : f32
    %113 = vector.broadcast %cst_41 : f32 to vector<2x8x1xf32>
    %114 = arith.subf %113, %112 : vector<2x8x1xf32>
    %115 = arith.mulf %111, %114 : vector<2x8x1xf32>
    "tpu.trace_start"() <{level = 10 : i32, message = "bqk,bkd->bqd"}> : () -> ()
    %cst_42 = arith.constant dense<0.000000e+00> : vector<2x8x8xf32>
    %116 = tpu.matmul %108, %102, %cst_42 {dimension_numbers = #tpu.dot_dimension_numbers<[2], [1], [1], [2], [0, 0, 0, 1, 1, 2], [0], [0]>} : vector<2x8x8xf32>, vector<2x8x8xf32>, vector<2x8x8xf32> -> vector<2x8x8xf32>
    "tpu.trace_stop"() : () -> ()
    %117 = vector.broadcast %115 : vector<2x8x1xf32> to vector<2x8x8xf32>
    %118 = arith.mulf %116, %117 : vector<2x8x8xf32>
    %119 = vector.shape_cast %118 : vector<2x8x8xf32> to vector<16x8xf32>
    %120 = vector.extract_strided_slice %46 {offsets = [0, 24], sizes = [16, 8], strides = [1, 1]} : vector<16x32xf32> to vector<16x8xf32>
    %121 = vector.shape_cast %120 : vector<16x8xf32> to vector<2x8x8xf32>
    %122 = vector.extract_strided_slice %50 {offsets = [0, 24], sizes = [16, 8], strides = [1, 1]} : vector<16x32xf32> to vector<16x8xf32>
    %123 = vector.shape_cast %122 : vector<16x8xf32> to vector<2x8x8xf32>
    %124 = vector.extract_strided_slice %39 {offsets = [0, 24], sizes = [16, 8], strides = [1, 1]} : vector<16x32xf32> to vector<16x8xf32>
    %125 = vector.shape_cast %124 : vector<16x8xf32> to vector<2x8x8xf32>
    "tpu.trace_start"() <{level = 10 : i32, message = "bqd,bkd->bqk"}> : () -> ()
    %cst_43 = arith.constant dense<0.000000e+00> : vector<2x8x8xf32>
    %126 = tpu.matmul %121, %123, %cst_43 {dimension_numbers = #tpu.dot_dimension_numbers<[2], [2], [1], [1], [0, 0, 0, 1, 1, 1], [0], [0]>} : vector<2x8x8xf32>, vector<2x8x8xf32>, vector<2x8x8xf32> -> vector<2x8x8xf32>
    "tpu.trace_stop"() : () -> ()
    %cst_44 = arith.constant dense<0xFF800000> : vector<2x8xf32>
    %127 = vector.multi_reduction <maximumf>, %126, %cst_44 [2] : vector<2x8x8xf32> to vector<2x8xf32>
    %128 = vector.shape_cast %127 : vector<2x8xf32> to vector<2x8x1xf32>
    %129 = vector.broadcast %128 : vector<2x8x1xf32> to vector<2x8x8xf32>
    %130 = arith.subf %126, %129 : vector<2x8x8xf32>
    %131 = math.exp %130 : vector<2x8x8xf32>
    %cst_45 = arith.constant dense<0.000000e+00> : vector<2x8xf32>
    %132 = vector.multi_reduction <add>, %131, %cst_45 [2] : vector<2x8x8xf32> to vector<2x8xf32>
    %133 = vector.shape_cast %132 : vector<2x8xf32> to vector<2x8x1xf32>
    %134 = tpu.reciprocal %133 {approx = true} : vector<2x8x1xf32> -> vector<2x8x1xf32>
    %135 = arith.mulf %133, %134 : vector<2x8x1xf32>
    %cst_46 = arith.constant 2.000000e+00 : f32
    %136 = vector.broadcast %cst_46 : f32 to vector<2x8x1xf32>
    %137 = arith.subf %136, %135 : vector<2x8x1xf32>
    %138 = arith.mulf %134, %137 : vector<2x8x1xf32>
    "tpu.trace_start"() <{level = 10 : i32, message = "bqk,bkd->bqd"}> : () -> ()
    %cst_47 = arith.constant dense<0.000000e+00> : vector<2x8x8xf32>
    %139 = tpu.matmul %131, %125, %cst_47 {dimension_numbers = #tpu.dot_dimension_numbers<[2], [1], [1], [2], [0, 0, 0, 1, 1, 2], [0], [0]>} : vector<2x8x8xf32>, vector<2x8x8xf32>, vector<2x8x8xf32> -> vector<2x8x8xf32>
    "tpu.trace_stop"() : () -> ()
    %140 = vector.broadcast %138 : vector<2x8x1xf32> to vector<2x8x8xf32>
    %141 = arith.mulf %139, %140 : vector<2x8x8xf32>
    %142 = vector.shape_cast %141 : vector<2x8x8xf32> to vector<16x8xf32>
    %143 = tpu.concatenate %73, %96, %119, %142 in 1 : vector<16x8xf32>, vector<16x8xf32>, vector<16x8xf32>, vector<16x8xf32> -> vector<16x32xf32>
    %c0_48 = arith.constant 0 : index
    %c0_49 = arith.constant 0 : index
    %c0_50 = arith.constant 0 : index
    %144 = vector.load %arg9[%c0_48, %c0_49, %c0_50] : memref<1x32x32xf32, #tpu.memory_space<vmem>>, vector<1x32x32xf32>
    %145 = vector.shape_cast %144 : vector<1x32x32xf32> to vector<32x32xf32>
    %cst_51 = arith.constant dense<0.000000e+00> : vector<16x32xf32>
    %146 = tpu.matmul %143, %145, %cst_51 {dimension_numbers = #tpu.dot_dimension_numbers<[1], [0], [0], [1], [0, 0, 1, 1], [], []>} : vector<16x32xf32>, vector<32x32xf32>, vector<16x32xf32> -> vector<16x32xf32>
    %c0_52 = arith.constant 0 : index
    %c0_53 = arith.constant 0 : index
    %c0_54 = arith.constant 0 : index
    %147 = vector.load %arg10[%c0_52, %c0_53, %c0_54] : memref<1x1x32xf32, #tpu.memory_space<vmem>>, vector<1x1x32xf32>
    %148 = vector.shape_cast %147 : vector<1x1x32xf32> to vector<1x32xf32>
    %149 = vector.broadcast %148 : vector<1x32xf32> to vector<16x32xf32>
    %150 = arith.addf %146, %149 : vector<16x32xf32>
    %151 = arith.addf %3, %150 : vector<16x32xf32>
    %c0_55 = arith.constant 0 : index
    %c0_56 = arith.constant 0 : index
    %c0_57 = arith.constant 0 : index
    %152 = vector.load %arg11[%c0_55, %c0_56, %c0_57] : memref<1x1x32xf32, #tpu.memory_space<vmem>>, vector<1x1x32xf32>
    %153 = vector.shape_cast %152 : vector<1x1x32xf32> to vector<1x32xf32>
    %c0_58 = arith.constant 0 : index
    %c0_59 = arith.constant 0 : index
    %c0_60 = arith.constant 0 : index
    %154 = vector.load %arg12[%c0_58, %c0_59, %c0_60] : memref<1x1x32xf32, #tpu.memory_space<vmem>>, vector<1x1x32xf32>
    %155 = vector.shape_cast %154 : vector<1x1x32xf32> to vector<1x32xf32>
    %cst_61 = arith.constant dense<0.000000e+00> : vector<16xf32>
    %156 = vector.multi_reduction <add>, %151, %cst_61 [1] : vector<16x32xf32> to vector<16xf32>
    %157 = vector.shape_cast %156 : vector<16xf32> to vector<16x1xf32>
    %cst_62 = arith.constant 3.200000e+01 : f32
    %158 = vector.broadcast %cst_62 : f32 to vector<16x1xf32>
    %159 = arith.divf %157, %158 : vector<16x1xf32>
    %160 = vector.broadcast %159 : vector<16x1xf32> to vector<16x32xf32>
    %161 = arith.subf %151, %160 : vector<16x32xf32>
    %162 = arith.mulf %161, %161 : vector<16x32xf32>
    %cst_63 = arith.constant dense<0.000000e+00> : vector<16xf32>
    %163 = vector.multi_reduction <add>, %162, %cst_63 [1] : vector<16x32xf32> to vector<16xf32>
    %164 = vector.shape_cast %163 : vector<16xf32> to vector<16x1xf32>
    %cst_64 = arith.constant 3.200000e+01 : f32
    %165 = vector.broadcast %cst_64 : f32 to vector<16x1xf32>
    %166 = arith.divf %164, %165 : vector<16x1xf32>
    %cst_65 = arith.constant 9.99999996E-13 : f32
    %167 = vector.broadcast %cst_65 : f32 to vector<16x1xf32>
    %168 = arith.addf %166, %167 : vector<16x1xf32>
    %169 = math.rsqrt %168 : vector<16x1xf32>
    %170 = vector.broadcast %169 : vector<16x1xf32> to vector<16x32xf32>
    %171 = arith.mulf %161, %170 : vector<16x32xf32>
    %172 = vector.broadcast %153 : vector<1x32xf32> to vector<16x32xf32>
    %173 = arith.mulf %171, %172 : vector<16x32xf32>
    %174 = vector.broadcast %155 : vector<1x32xf32> to vector<16x32xf32>
    %175 = arith.addf %173, %174 : vector<16x32xf32>
    %c0_66 = arith.constant 0 : index
    %c0_67 = arith.constant 0 : index
    %c0_68 = arith.constant 0 : index
    %176 = vector.load %arg13[%c0_66, %c0_67, %c0_68] : memref<1x32x64xf32, #tpu.memory_space<vmem>>, vector<1x32x64xf32>
    %177 = vector.shape_cast %176 : vector<1x32x64xf32> to vector<32x64xf32>
    %cst_69 = arith.constant dense<0.000000e+00> : vector<16x64xf32>
    %178 = tpu.matmul %175, %177, %cst_69 {dimension_numbers = #tpu.dot_dimension_numbers<[1], [0], [0], [1], [0, 0, 1, 1], [], []>} : vector<16x32xf32>, vector<32x64xf32>, vector<16x64xf32> -> vector<16x64xf32>
    %c0_70 = arith.constant 0 : index
    %c0_71 = arith.constant 0 : index
    %c0_72 = arith.constant 0 : index
    %179 = vector.load %arg14[%c0_70, %c0_71, %c0_72] : memref<1x1x64xf32, #tpu.memory_space<vmem>>, vector<1x1x64xf32>
    %180 = vector.shape_cast %179 : vector<1x1x64xf32> to vector<1x64xf32>
    %181 = vector.broadcast %180 : vector<1x64xf32> to vector<16x64xf32>
    %182 = arith.addf %178, %181 : vector<16x64xf32>
    %cst_73 = arith.constant 5.000000e-01 : f32
    %183 = vector.broadcast %cst_73 : f32 to vector<16x64xf32>
    %184 = arith.mulf %182, %183 : vector<16x64xf32>
    %cst_74 = arith.constant 0.707106769 : f32
    %185 = vector.broadcast %cst_74 : f32 to vector<16x64xf32>
    %186 = arith.mulf %182, %185 : vector<16x64xf32>
    %187 = math.absf %186 : vector<16x64xf32>
    %cst_75 = arith.constant 0.327591091 : f32
    %188 = vector.broadcast %cst_75 : f32 to vector<16x64xf32>
    %189 = arith.mulf %188, %187 : vector<16x64xf32>
    %cst_76 = arith.constant 1.000000e+00 : f32
    %190 = vector.broadcast %cst_76 : f32 to vector<16x64xf32>
    %191 = arith.addf %190, %189 : vector<16x64xf32>
    %cst_77 = arith.constant 1.000000e+00 : f32
    %192 = vector.broadcast %cst_77 : f32 to vector<16x64xf32>
    %193 = arith.divf %192, %191 : vector<16x64xf32>
    %cst_78 = arith.constant 1.06140542 : f32
    %194 = vector.broadcast %cst_78 : f32 to vector<16x64xf32>
    %195 = arith.mulf %194, %193 : vector<16x64xf32>
    %cst_79 = arith.constant -1.45315206 : f32
    %196 = vector.broadcast %cst_79 : f32 to vector<16x64xf32>
    %197 = arith.addf %195, %196 : vector<16x64xf32>
    %198 = arith.mulf %197, %193 : vector<16x64xf32>
    %cst_80 = arith.constant 1.42141378 : f32
    %199 = vector.broadcast %cst_80 : f32 to vector<16x64xf32>
    %200 = arith.addf %198, %199 : vector<16x64xf32>
    %201 = arith.mulf %200, %193 : vector<16x64xf32>
    %cst_81 = arith.constant -0.284496725 : f32
    %202 = vector.broadcast %cst_81 : f32 to vector<16x64xf32>
    %203 = arith.addf %201, %202 : vector<16x64xf32>
    %204 = arith.mulf %203, %193 : vector<16x64xf32>
    %cst_82 = arith.constant 0.254829586 : f32
    %205 = vector.broadcast %cst_82 : f32 to vector<16x64xf32>
    %206 = arith.addf %204, %205 : vector<16x64xf32>
    %207 = arith.mulf %206, %193 : vector<16x64xf32>
    %cst_83 = arith.constant 0.000000e+00 : f32
    %208 = vector.broadcast %cst_83 : f32 to vector<16x64xf32>
    %209 = arith.subf %208, %187 : vector<16x64xf32>
    %210 = arith.mulf %209, %187 : vector<16x64xf32>
    %211 = math.exp %210 : vector<16x64xf32>
    %212 = arith.mulf %207, %211 : vector<16x64xf32>
    %cst_84 = arith.constant 1.000000e+00 : f32
    %213 = vector.broadcast %cst_84 : f32 to vector<16x64xf32>
    %214 = arith.subf %213, %212 : vector<16x64xf32>
    %cst_85 = arith.constant 0.000000e+00 : f32
    %215 = vector.broadcast %cst_85 : f32 to vector<16x64xf32>
    %216 = arith.cmpf oge, %186, %215 : vector<16x64xf32>
    %cst_86 = arith.constant 0.000000e+00 : f32
    %217 = vector.broadcast %cst_86 : f32 to vector<16x64xf32>
    %218 = arith.subf %217, %214 : vector<16x64xf32>
    %219 = arith.select %216, %214, %218 : vector<16x64xi1>, vector<16x64xf32>
    %cst_87 = arith.constant 1.000000e+00 : f32
    %220 = vector.broadcast %cst_87 : f32 to vector<16x64xf32>
    %221 = arith.addf %220, %219 : vector<16x64xf32>
    %222 = arith.mulf %184, %221 : vector<16x64xf32>
    %c0_88 = arith.constant 0 : index
    %c0_89 = arith.constant 0 : index
    %c0_90 = arith.constant 0 : index
    %223 = vector.load %arg15[%c0_88, %c0_89, %c0_90] : memref<1x64x32xf32, #tpu.memory_space<vmem>>, vector<1x64x32xf32>
    %224 = vector.shape_cast %223 : vector<1x64x32xf32> to vector<64x32xf32>
    %cst_91 = arith.constant dense<0.000000e+00> : vector<16x32xf32>
    %225 = tpu.matmul %222, %224, %cst_91 {dimension_numbers = #tpu.dot_dimension_numbers<[1], [0], [0], [1], [0, 0, 1, 1], [], []>} : vector<16x64xf32>, vector<64x32xf32>, vector<16x32xf32> -> vector<16x32xf32>
    %c0_92 = arith.constant 0 : index
    %c0_93 = arith.constant 0 : index
    %c0_94 = arith.constant 0 : index
    %226 = vector.load %arg16[%c0_92, %c0_93, %c0_94] : memref<1x1x32xf32, #tpu.memory_space<vmem>>, vector<1x1x32xf32>
    %227 = vector.shape_cast %226 : vector<1x1x32xf32> to vector<1x32xf32>
    %228 = vector.broadcast %227 : vector<1x32xf32> to vector<16x32xf32>
    %229 = arith.addf %225, %228 : vector<16x32xf32>
    %230 = arith.addf %151, %229 : vector<16x32xf32>
    %c0_95 = arith.constant 0 : index
    %c0_96 = arith.constant 0 : index
    %231 = vector.load %arg19[%c0_95, %c0_96] : memref<16x32xf32, #tpu.memory_space<vmem>>, vector<16x32xf32>
    tpu.vector_store %arg19[%c0_95, %c0_96], %230 {strides = array<i32>} : memref<16x32xf32, #tpu.memory_space<vmem>>, vector<16x32xf32>,
    %c1_i32 = arith.constant 1 : i32
    %232 = arith.cmpi eq, %arg0, %c1_i32 : i32
    %233 = arith.extui %232 : i1 to i32
    %c0_i32_97 = arith.constant 0 : i32
    %234 = arith.cmpi ne, %233, %c0_i32_97 : i32
    scf.if %234 {
      %c0_98 = arith.constant 0 : index
      %c0_99 = arith.constant 0 : index
      %235 = vector.load %arg17[%c0_98, %c0_99] : memref<1x32xf32, #tpu.memory_space<vmem>>, vector<1x32xf32>
      %c0_100 = arith.constant 0 : index
      %c0_101 = arith.constant 0 : index
      %236 = vector.load %arg18[%c0_100, %c0_101] : memref<1x32xf32, #tpu.memory_space<vmem>>, vector<1x32xf32>
      %cst_102 = arith.constant dense<0.000000e+00> : vector<16xf32>
      %237 = vector.multi_reduction <add>, %230, %cst_102 [1] : vector<16x32xf32> to vector<16xf32>
      %238 = vector.shape_cast %237 : vector<16xf32> to vector<16x1xf32>
      %cst_103 = arith.constant 3.200000e+01 : f32
      %239 = vector.broadcast %cst_103 : f32 to vector<16x1xf32>
      %240 = arith.divf %238, %239 : vector<16x1xf32>
      %241 = vector.broadcast %240 : vector<16x1xf32> to vector<16x32xf32>
      %242 = arith.subf %230, %241 : vector<16x32xf32>
      %243 = arith.mulf %242, %242 : vector<16x32xf32>
      %cst_104 = arith.constant dense<0.000000e+00> : vector<16xf32>
      %244 = vector.multi_reduction <add>, %243, %cst_104 [1] : vector<16x32xf32> to vector<16xf32>
      %245 = vector.shape_cast %244 : vector<16xf32> to vector<16x1xf32>
      %cst_105 = arith.constant 3.200000e+01 : f32
      %246 = vector.broadcast %cst_105 : f32 to vector<16x1xf32>
      %247 = arith.divf %245, %246 : vector<16x1xf32>
      %cst_106 = arith.constant 9.99999996E-13 : f32
      %248 = vector.broadcast %cst_106 : f32 to vector<16x1xf32>
      %249 = arith.addf %247, %248 : vector<16x1xf32>
      %250 = math.rsqrt %249 : vector<16x1xf32>
      %251 = vector.broadcast %250 : vector<16x1xf32> to vector<16x32xf32>
      %252 = arith.mulf %242, %251 : vector<16x32xf32>
      %253 = vector.broadcast %235 : vector<1x32xf32> to vector<16x32xf32>
      %254 = arith.mulf %252, %253 : vector<16x32xf32>
      %255 = vector.broadcast %236 : vector<1x32xf32> to vector<16x32xf32>
      %256 = arith.addf %254, %255 : vector<16x32xf32>
      %c0_107 = arith.constant 0 : index
      %c0_108 = arith.constant 0 : index
      %257 = vector.load %arg19[%c0_107, %c0_108] : memref<16x32xf32, #tpu.memory_space<vmem>>, vector<16x32xf32>
      tpu.vector_store %arg19[%c0_107, %c0_108], %256 {strides = array<i32>} : memref<16x32xf32, #tpu.memory_space<vmem>>, vector<16x32xf32>,
    } else {
    }
    return
  }
  func.func @transform_0(%arg0: i32) -> (i32, i32) {
    %c0_i32 = arith.constant 0 : i32
    %c0_i32_0 = arith.constant 0 : i32
    %c0_i32_1 = arith.constant 0 : i32
    return %c0_i32, %c0_i32_0 : i32, i32
  }
  func.func @transform_1(%arg0: i32) -> (i32, i32) {
    %c0_i32 = arith.constant 0 : i32
    %c0_i32_0 = arith.constant 0 : i32
    %c0_i32_1 = arith.constant 0 : i32
    return %c0_i32, %c0_i32_0 : i32, i32
  }
  func.func @transform_2(%arg0: i32) -> (i32, i32) {
    %c0_i32 = arith.constant 0 : i32
    %c0_i32_0 = arith.constant 0 : i32
    %c0_i32_1 = arith.constant 0 : i32
    return %c0_i32, %c0_i32_0 : i32, i32
  }
  func.func @transform_3(%arg0: i32) -> (i32, i32) {
    %c0_i32 = arith.constant 0 : i32
    %c0_i32_0 = arith.constant 0 : i32
    %c0_i32_1 = arith.constant 0 : i32
    return %c0_i32, %c0_i32_0 : i32, i32
  }
  func.func @transform_4(%arg0: i32) -> (i32, i32, i32) {
    %c0_i32 = arith.constant 0 : i32
    %c0_i32_0 = arith.constant 0 : i32
    %c0_i32_1 = arith.constant 0 : i32
    return %arg0, %c0_i32, %c0_i32_0 : i32, i32, i32
  }
  func.func @transform_5(%arg0: i32) -> (i32, i32, i32) {
    %c0_i32 = arith.constant 0 : i32
    %c0_i32_0 = arith.constant 0 : i32
    %c0_i32_1 = arith.constant 0 : i32
    return %arg0, %c0_i32, %c0_i32_0 : i32, i32, i32
  }
  func.func @transform_6(%arg0: i32) -> (i32, i32, i32) {
    %c0_i32 = arith.constant 0 : i32
    %c0_i32_0 = arith.constant 0 : i32
    %c0_i32_1 = arith.constant 0 : i32
    return %arg0, %c0_i32, %c0_i32_0 : i32, i32, i32
  }
  func.func @transform_7(%arg0: i32) -> (i32, i32, i32) {
    %c0_i32 = arith.constant 0 : i32
    %c0_i32_0 = arith.constant 0 : i32
    %c0_i32_1 = arith.constant 0 : i32
    return %arg0, %c0_i32, %c0_i32_0 : i32, i32, i32
  }
  func.func @transform_8(%arg0: i32) -> (i32, i32, i32) {
    %c0_i32 = arith.constant 0 : i32
    %c0_i32_0 = arith.constant 0 : i32
    %c0_i32_1 = arith.constant 0 : i32
    return %arg0, %c0_i32, %c0_i32_0 : i32, i32, i32
  }
  func.func @transform_9(%arg0: i32) -> (i32, i32, i32) {
    %c0_i32 = arith.constant 0 : i32
    %c0_i32_0 = arith.constant 0 : i32
    %c0_i32_1 = arith.constant 0 : i32
    return %arg0, %c0_i32, %c0_i32_0 : i32, i32, i32
  }
  func.func @transform_10(%arg0: i32) -> (i32, i32, i32) {
    %c0_i32 = arith.constant 0 : i32
    %c0_i32_0 = arith.constant 0 : i32
    %c0_i32_1 = arith.constant 0 : i32
    return %arg0, %c0_i32, %c0_i32_0 : i32, i32, i32
  }
  func.func @transform_11(%arg0: i32) -> (i32, i32, i32) {
    %c0_i32 = arith.constant 0 : i32
    %c0_i32_0 = arith.constant 0 : i32
    %c0_i32_1 = arith.constant 0 : i32
    return %arg0, %c0_i32, %c0_i32_0 : i32, i32, i32
  }
  func.func @transform_12(%arg0: i32) -> (i32, i32, i32) {
    %c0_i32 = arith.constant 0 : i32
    %c0_i32_0 = arith.constant 0 : i32
    %c0_i32_1 = arith.constant 0 : i32
    return %arg0, %c0_i32, %c0_i32_0 : i32, i32, i32
  }
  func.func @transform_13(%arg0: i32) -> (i32, i32, i32) {
    %c0_i32 = arith.constant 0 : i32
    %c0_i32_0 = arith.constant 0 : i32
    %c0_i32_1 = arith.constant 0 : i32
    return %arg0, %c0_i32, %c0_i32_0 : i32, i32, i32
  }
  func.func @transform_14(%arg0: i32) -> (i32, i32, i32) {
    %c0_i32 = arith.constant 0 : i32
    %c0_i32_0 = arith.constant 0 : i32
    %c0_i32_1 = arith.constant 0 : i32
    return %arg0, %c0_i32, %c0_i32_0 : i32, i32, i32
  }
  func.func @transform_15(%arg0: i32) -> (i32, i32, i32) {
    %c0_i32 = arith.constant 0 : i32
    %c0_i32_0 = arith.constant 0 : i32
    %c0_i32_1 = arith.constant 0 : i32
    return %arg0, %c0_i32, %c0_i32_0 : i32, i32, i32
  }
  func.func @transform_16(%arg0: i32) -> (i32, i32) {
    %c0_i32 = arith.constant 0 : i32
    %c0_i32_0 = arith.constant 0 : i32
    %c0_i32_1 = arith.constant 0 : i32
    return %c0_i32, %c0_i32_0 : i32, i32
  }
  func.func @transform_17(%arg0: i32) -> (i32, i32) {
    %c0_i32 = arith.constant 0 : i32
    %c0_i32_0 = arith.constant 0 : i32
    %c0_i32_1 = arith.constant 0 : i32
    return %c0_i32, %c0_i32_0 : i32, i32
  }
  func.func @transform_18(%arg0: i32) -> (i32, i32) {
    %c0_i32 = arith.constant 0 : i32
    %c0_i32_0 = arith.constant 0 : i32
    %c0_i32_1 = arith.constant 0 : i32
    return %c0_i32, %c0_i32_0 : i32, i32
  }
}

</mosaic_0001>

<bundles_post_ra>
// kernel: esm_encoder_forward.1
= control target key start
LH: loop header
LB: loop body
LE: loop exit
PB: predicated region body
PF: predicated region fallthrough
CT: control target
= control target key end

     0   :  { %s4057_s0 = inlined_call_operand.vmem [shape: f32[16,32], index: 0, kind: input, shape index: {}]   ;;  %s4058_s1 = inlined_call_operand.vmem [shape: f32[16,32], index: 1, kind: input, shape index: {}]   ;;  %s4059_s2 = inlined_call_operand.vmem [shape: f32[16,32], index: 2, kind: input, shape index: {}]   ;;  %s4060_s3 = inlined_call_operand.vmem [shape: f32[32,32], index: 3, kind: input, shape index: {}]   ;;  %s4061_s4 = inlined_call_operand.vmem [shape: f32[2,1,32], index: 4, kind: input, shape index: {}]   ;;  %s4062_s5 = inlined_call_operand.vmem [shape: f32[2,1,32], index: 5, kind: input, shape index: {}]   ;;  %s4063_s6 = inlined_call_operand.vmem [shape: f32[2,32,96], index: 6, kind: input, shape index: {}]   ;;  %s4064_s7 = inlined_call_operand.vmem [shape: f32[2,1,96], index: 7, kind: input, shape index: {}]   ;;  %s4065_s8 = inlined_call_operand.vmem [shape: f32[2,32,32], index: 8, kind: input, shape index: {}]   ;;  %s4066_s9 = inlined_call_operand.vmem [shape: f32[2,1,32], index: 9, kind: input, shape index: {}]   ;;  %s4067_s10 = inlined_call_operand.vmem [shape: f32[2,1,32], index: 10, kind: input, shape index: {}]   ;;  %s4068_s11 = inlined_call_operand.vmem [shape: f32[2,1,32], index: 11, kind: input, shape index: {}]   ;;  %s4069_s12 = inlined_call_operand.vmem [shape: f32[2,32,64], index: 12, kind: input, shape index: {}]   ;;  %s4070_s13 = inlined_call_operand.vmem [shape: f32[2,1,64], index: 13, kind: input, shape index: {}]   ;;  %s4071_s14 = inlined_call_operand.vmem [shape: f32[2,64,32], index: 14, kind: input, shape index: {}]   ;;  %s4072_s15 = inlined_call_operand.vmem [shape: f32[2,1,32], index: 15, kind: input, shape index: {}]   ;;  %s4073_s16 = inlined_call_operand.vmem [shape: f32[1,32], index: 16, kind: input, shape index: {}]   ;;  %s4074_s17 = inlined_call_operand.vmem [shape: f32[1,32], index: 17, kind: input, shape index: {}]   ;;  %s4075_s18 = inlined_call_operand.hbm [shape: f32[16,32], index: 18, kind: output, shape index: {}]  }
   0x1   :  { %4082 = sst [smem:[#allocation7_spill]] %s4057_s0 }
   0x2   :  { %4083 = sst [smem:[#allocation8_spill]] %s4058_s1 }
   0x3   :  { %4084 = sst [smem:[#allocation9_spill]] %s4059_s2 }
   0x4   :  { %4085 = sst [smem:[#allocation10_spill]] %s4063_s6 }
   0x5   :  { %4086 = sst [smem:[#allocation11_spill]] %s4065_s8 }
   0x6   :  { %4087 = sst [smem:[#allocation12_spill]] %s4073_s16 }
   0x7   :  { %4088 = sst [smem:[#allocation13_spill]] %s4074_s17 }
   0x8   :  { %4089 = sst [smem:[#allocation14_spill]] %s4075_s18 }
   0x9   :  { %23 = vsyncpa [#allocation3], 0  ;;  %s3642_s27 = smov 0  }
   0xa LB: > { %4090 = sst [smem:[#allocation5_spill]] %s3526_s27  ;;  %s3648_s28 = sadd.s32 4294967295, %s3526_s27   ;;  %s3526_s27 = sphi %s3642_s27, %s29_s27  }
   0xb   : > { %p3058_p0 = scmp.ge.s32.totalorder %s3526_s27, 1  ;;  %p602_p1 = scmp.lt.s32.totalorder %s3526_s27, 3 }
   0xd   : > { %p603_p2 = pnand %p3058_p0, %p602_p1 }
   0xf   : > { %606 = sbr.rel (%p603_p2) target bundleno = 4329 (0x10e9), region = 92 }
  0x16   : > { %p690_p3 = scmp.lt.s32.totalorder %s3648_s28, 1  ;;  %s4091_s6 = sld [smem:[#allocation10_spill]] }
  0x17   : > { %s4092_s8 = sld [smem:[#allocation11_spill]]  ;;  %p3067_p4 = scmp.ne.s32.totalorder %s3648_s28, 0 }
  0x18   : > { %s3654_s29 = scalar_select %p690_p3, %s3648_s28, 1 }
  0x19   : > { %737 = sbr.rel (%p3067_p4) target bundleno = 33 (0x21), region = 96  ;;  %s4094_s25 = sld [smem:[#allocation7_spill]] (!%p3067_p4)  ;;  %vm740_vm0 = vcmask (!%p3067_p4), 261120  }
  0x1a   : > { %s3119_s22 = sshll.u32 %s3654_s29, 5  ;;  %s714_s16 = scalar_lea.vmem %s4067_s10, %s3654_s29 }
  0x1b   : > { %s717_s24 = scalar_lea.vmem %s4068_s11, %s3654_s29  ;;  %s733_s2 = scalar_lea.vmem %s4072_s15, %s3654_s29 }
  0x1c   : > { %s3672_s30 = scalar_lea.vmem %s4091_s6, %s3119_s22  ;;  %s3694_s6 = scalar_lea.vmem %s4069_s12, %s3119_s22 }
  0x1d   : > { %s3677_s18 = scalar_lea.vmem %s4092_s8, %s3119_s22  ;;  %s725_s8 = scalar_lea.vmem %s4070_s13, %s3654_s29 }
  0x1e   : > { %4093 = sst [smem:[#allocation6_spill]] %s3677_s18  ;;  %s3122_s18 = sshll.u32 %s3654_s29, 6 }
  0x1f   : > { %s3704_s1 = scalar_lea.vmem %s4071_s14, %s3122_s18  ;;  %v738_v0 = vld [vmem:[%s4094_s25] sm:$0xff] (!%p3067_p4)  ;;  %v739_v1 = vld [vmem:[%s4094_s25 + $0x8] sm:$0xff] (!%p3067_p4) }
  0x20   : > { %741 = vst.msk [vmem:[#allocation2] sm:$0xff] %vm740_vm0, %v738_v0  ;;  %742 = vst.msk [vmem:[#allocation2 + $0x8] sm:$0xff] %vm740_vm0, %v739_v1 }
  0x21 PF: > { %vm747_vm1 = vcmask 261120   ;;  %v791_v16 = vld [vmem:[%s3672_s30] sm:$0xff]  ;;  %v792_v17 = vld [vmem:[%s3672_s30 + $0x8] sm:$0xff]  ;;  %v793_v18 = vld [vmem:[%s3672_s30 + $0x10] sm:$0xff]  ;;  %s4095_s20 = scalar_lea.vmem %s4061_s4, %s3654_s29  ;;  %s4096_s26 = scalar_lea.vmem %s4062_s5, %s3654_s29  ;;  %vm3531_vm2 = vmmov 0   ;;  %vm1090_vm3 = vcmask 64512  }
  0x22   : > { %v3349_v19 = vpack.c.bf16 %v792_v17, %v791_v16  ;;  %v794_v20 = vld [vmem:[%s3672_s30 + $0x18] sm:$0xff]  ;;  %v889_v22 = vld [vmem:[%s4060_s3] sm:$0xff]  ;;  %v890_v23 = vld [vmem:[%s4060_s3 + $0x8] sm:$0xff]  ;;  %s4097_s21 = scalar_lea.vmem %s4064_s7, %s3654_s29  ;;  %s4098_s22 = sld [smem:[#allocation8_spill]]  ;;  %vm2458_vm4 = vcmask 130048   ;;  %vm2461_vm5 = vcmask 195584  }
  0x23   : > { %v3353_v21 = vpack.c.bf16 %v794_v20, %v793_v18  ;;  %v3357_v24 = vpack.c.bf16 %v890_v23, %v889_v22  ;;  %v3068_v32 = vld [vmem:[%s4095_s20] ss:$0 sm:$0xff]  ;;  %v891_v41 = vld [vmem:[%s4060_s3 + $0x10] sm:$0xff]  ;;  %v892_v42 = vld [vmem:[%s4060_s3 + $0x18] sm:$0xff]  ;;  %s3529_s0 = smov 32   ;;  %s4099_s30 = sld [smem:[#allocation9_spill]] }
  0x24   : > { %3350 = vmatprep.subr.bf16.mxu1 %v3349_v19  ;;  %v3069_v34 = vld [vmem:[%s4096_s26] ss:$0 sm:$0xff]  ;;  %v3361_v43 = vpack.c.bf16 %v892_v42, %v891_v41  ;;  %s3528_s26 = smov 96   ;;  %s3532_s23 = smov 64   ;;  %vm2763_vm8 = vcmask 523264  }
  0x25   : > { %3352 = vmatpush3.bf16.msra.mxu1 %v3349_v19  ;;  %3366 = vmatprep.subr.bf16.mxu0 %v3357_v24  ;;  %v3070_v44 = vld [vmem:[%s4097_s21] ss:$0 sm:$0xff]  ;;  %s3533_s27 = smov 88   ;;  %s3535_s18 = smov 56  }
  0x26   : > { %3354 = vmatprep.subr.bf16.mxu1 %v3353_v21  ;;  %3368 = vmatpush3.bf16.msra.mxu0 %v3357_v24  ;;  %s3537_s17 = smov 112   ;;  %s3538_s19 = smov 48  }
  0x27   : > { %v3717_v2 = vld [vmem:[#allocation2] sm:$0xff]  ;;  %v3719_v3 = vld [vmem:[#allocation2 + $0x8] sm:$0xff]  ;;  %3370 = vmatprep.subr.bf16.mxu0 %v3361_v43  ;;  %s3539_s21 = smov 72   ;;  %s3540_s20 = smov 104  }
  0x28   : > { %v748_v4 = vsel %vm747_vm1, %v3717_v2, 0.0  ;;  %v751_v5 = vsel %vm747_vm1, %v3719_v3, 0.0  ;;  %v886_v49 = vld [vmem:[%s4098_s22 + $0x8] sm:$0xff]  ;;  %v885_v50 = vld [vmem:[%s4098_s22] sm:$0xff]  ;;  %p3112_p5 = scmp.ne.s32.totalorder %s3648_s28, 1 }
  0x29   : > { %749 = vadd.xlane.f32.xlu0 %v748_v4  ;;  %3356 = vmatpush3.bf16.msra.mxu1 %v3353_v21  ;;  %v888_v57 = vld [vmem:[%s4099_s30 + $0x8] sm:$0xff]  ;;  %v887_v58 = vld [vmem:[%s4099_s30] sm:$0xff] }
  0x2a   : > { %3358 = vmatprep.subr.bf16.mxu1 %v3357_v24  ;;  %3372 = vmatpush3.bf16.msra.mxu0 %v3361_v43 }
  0x2d   : > { %752 = vadd.xlane.f32.xlu0 %v751_v5 }
  0xb6   : > { %v750_v6 = vpop.xlane.xlu0 %749 }
  0xb7   : > { %v755_v7 = vmul.f32 0.03125, %v750_v6 }
  0xb9   : > { %v757_v8 = vsub.f32 %v3717_v2, %v755_v7  ;;  %v3530_v7 = vmov 0.0  }
  0xba   : > { %v753_v9 = vpop.xlane.xlu0 %752  ;;  %3238 = vmatprep.subr.mxu0 %v3530_v7 }
  0xbb   : > { %v756_v10 = vmul.f32 0.03125, %v753_v9  ;;  %v759_v11 = vmul.f32 %v757_v8, %v757_v8 }
  0xbd   : > { %v758_v12 = vsub.f32 %v3719_v3, %v756_v10  ;;  %v761_v13 = vsel %vm747_vm1, %v759_v11, 0.0 }
  0xbe   : > { %762 = vadd.xlane.f32.xlu1 %v761_v13 }
  0xbf   : > { %v760_v14 = vmul.f32 %v758_v12, %v758_v12 }
  0xc1   : > { %v764_v15 = vsel %vm747_vm1, %v760_v14, 0.0 }
  0xc2   : > { %765 = vadd.xlane.f32.xlu1 %v764_v15 }
 0x14b   : > { %v763_v25 = vpop.xlane.xlu1 %762 }
 0x14c   : > { %v767_v26 = vmul.f32 0.03125, %v763_v25 }
 0x14e   : > { %v769_v27 = vadd.f32 1e-12, %v767_v26 }
 0x14f   : > { %v766_v28 = vpop.xlane.xlu1 %765 }
 0x150   : > { %3438 = vrsqrt.f32 %v769_v27  ;;  %v768_v29 = vmul.f32 0.03125, %v766_v28 }
 0x152   : > { %v770_v30 = vadd.f32 1e-12, %v768_v29 }
 0x154   : > { %3440 = vrsqrt.f32 %v770_v30 }
 0x15a   : > { %v3439_v31 = vpop.eup %3438 }
 0x15b   : > { %v773_v33 = vmul.f32 %v3439_v31, %v757_v8 }
 0x15d   : > { %v781_v35 = vmul.f32 %v3068_v32, %v773_v33 }
 0x15e   : > { %v3441_v36 = vpop.eup %3440 }
 0x15f   : > { %v774_v37 = vmul.f32 %v3441_v36, %v758_v12  ;;  %v789_v38 = vadd.f32 %v3069_v34, %v781_v35 }
 0x161   : > { %v782_v39 = vmul.f32 %v3068_v32, %v774_v37  ;;  %3203 = vmatprep.mubr.msk.f32.mxu1 %vm747_vm1, %v789_v38 }
 0x163   : > { %v790_v40 = vadd.f32 %v3069_v34, %v782_v39 }
 0x165   : > { %3204 = vmatmul.mubr.msk.f32.vlgmr.msra.gmra.mrb[0].mxu1 %vm747_vm1, %v790_v40 }
 0x166   : > { %3360 = vmatpush3.bf16.msra.mxu1 %v3357_v24 }
 0x167   : > { %3362 = vmatprep.subr.bf16.mxu1 %v3361_v43 }
 0x16a   : > { %3364 = vmatpush3.bf16.msra.mxu1 %v3361_v43 }
 0x16b   : > { %3228 = vmatprep.subr.mxu1 %v3530_v7 }
 0x238   : > { %v3205_v45 = vpop.f32.mrb[0].mxu1 }
 0x239   : > { %v3762_v46 = vadd.f32 %v3205_v45, %v3070_v44  ;;  %v874_v47 = vpop.f32.mrb[1].mxu1 }
 0x23a   : > { %v3764_v48 = vadd.f32 %v3070_v44, %v874_v47 }
 0x23b   : > { %994 = vrot.lane.b32.xlu1 %v3762_v46, %s3528_s26  ;;  %v884_v51 = vmul.f32 0.35355338, %v3762_v46 }
 0x23c   : > { %992 = vrot.lane.b32.xlu0 %v3764_v48, %s3528_s26  ;;  %v883_v52 = vmul.f32 0.35355338, %v3764_v48 }
 0x23d   : > { %v894_v53 = vmul.f32 %v886_v49, %v884_v51 }
 0x23e   : > { %3214 = vmatprep.mubr.msk.f32.mxu1 %vm747_vm1, %v883_v52  ;;  %v893_v54 = vmul.f32 %v885_v50, %v883_v52 }
 0x23f   : > { %982 = vrot.lane.b32.xlu1 %v885_v50, %s3529_s0  ;;  %3215 = vmatmul.mubr.msk.f32.vlgmr.msra.gmra.mrb[2].mxu1 %vm747_vm1, %v884_v51 }
 0x240   : > { %984 = vrot.lane.b32.xlu0 %v886_v49, %s3529_s0  ;;  %3230 = vmatprep.mubr.msk.f32.mxu1 %vm3531_vm2, %v3530_v7 }
 0x2ad   : > { %v995_v56 = vpop.permute.xlu1 %994 }
 0x2ae   : > { %v993_v55 = vpop.permute.xlu0 %992 }
 0x2af   : > { %3225 = vmatprep.mubr.msk.f32.mxu0 %vm747_vm1, %v993_v55 }
 0x2b0   : > { %3226 = vmatmul.mubr.msk.f32.vlgmr.msra.gmra.mrb[0].mxu0 %vm747_vm1, %v995_v56 }
 0x2b1   : > { %3240 = vmatprep.mubr.msk.f32.mxu0 %vm3531_vm2, %v3530_v7  ;;  %v983_v8 = vpop.permute.xlu1 %982 }
 0x2b2   : > { %v988_v9 = vmul.f32 %v983_v8, %v3764_v48  ;;  %v985_v10 = vpop.permute.xlu0 %984 }
 0x2b3   : > { %v989_v13 = vmul.f32 %v985_v10, %v3762_v46 }
 0x312   : > { %v3216_v59 = vpop.f32.mrb[2].mxu1 }
 0x313   : > { %v977_v60 = vmul.f32 %v3216_v59, %v888_v57  ;;  %v967_v61 = vpop.f32.mrb[3].mxu1 }
 0x314   : > { %v976_v62 = vmul.f32 %v967_v61, %v887_v58 }
 0x315   : > { %v3788_v63 = vadd.f32 %v977_v60, %v894_v53 }
 0x316   : > { %v3790_v0 = vadd.f32 %v976_v62, %v893_v54 }
 0x383   : > { %v3227_v1 = vpop.f32.mrb[0].mxu0 }
 0x384   : > { %v1066_v4 = vpop.f32.mrb[1].mxu0  ;;  %v1076_v6 = vmul.f32 %v3227_v1, %v888_v57 }
 0x385   : > { %v1075_v5 = vmul.f32 %v1066_v4, %v887_v58 }
 0x387   : > { %1079 = vrot.lane.b32.xlu1 %v1075_v5, %s3529_s0 }
 0x38b   : > { %1081 = vrot.lane.b32.xlu1 %v1076_v6, %s3529_s0  ;;  %s3536_s0 = smov 80  }
 0x3f9   : > { %v1080_v11 = vpop.permute.xlu1 %1079 }
 0x3fa   : > { %v3799_v12 = vadd.f32 %v1080_v11, %v988_v9 }
 0x3fc   : > { %1088 = vrot.lane.b32.xlu0 %v3799_v12, %s3528_s26 }
 0x3fd   : > { %v1082_v14 = vpop.permute.xlu1 %1081 }
 0x3fe   : > { %v3804_v15 = vadd.f32 %v1082_v14, %v989_v13 }
 0x400   : > { %1167 = vrot.lane.b32.xlu1 %v3804_v15, %s3528_s26  ;;  %1270 = vrot.lane.b32.xlu0 %v3764_v48, %s3532_s23  ;;  %s3534_s26 = smov 120  }
 0x404   : > { %1346 = vrot.lane.b32.xlu1 %v3762_v46, %s3532_s23  ;;  %s3541_s23 = smov 40  }
 0x408   : > { %1504 = vrot.lane.b32.xlu1 %v3804_v15, %s3533_s27 }
 0x46e   : > { %v1089_v16 = vpop.permute.xlu0 %1088 }
 0x46f   : > { %3229 = vmatpush3.xpose.msk.msra.mxu1 %vm1090_vm3, %v1089_v16 }
 0x470   : > { %3233 = vmatprep.subr.mxu1 %v3530_v7 }
 0x472   : > { %v1168_v17 = vpop.permute.xlu1 %1167  ;;  %v1271_v18 = vpop.permute.xlu0 %1270  ;;  %3231 = vmatmul.mubr.msk.f32.vlgmr.msra.gmra.mrb[4].mxu1 %vm1090_vm3, %v3790_v0 }
 0x473   : > { %3234 = vmatpush3.xpose.msk.msra.mxu1 %vm1090_vm3, %v1168_v17  ;;  %3239 = vmatpush3.msra.mxu0 %v1271_v18 }
 0x474   : > { %3235 = vmatprep.mubr.msk.f32.mxu1 %vm3531_vm2, %v3530_v7  ;;  %3243 = vmatprep.subr.mxu1 %v3530_v7 }
 0x475   : > { %3248 = vmatprep.subr.mxu0 %v3530_v7 }
 0x476   : > { %v1347_v19 = vpop.permute.xlu1 %1346  ;;  %3236 = vmatmul.mubr.msk.f32.vlgmr.msra.gmra.mrb[6].mxu1 %vm1090_vm3, %v3788_v63 }
 0x477   : > { %3244 = vmatpush3.msra.mxu1 %v1347_v19  ;;  %3245 = vmatprep.mubr.msk.f32.mxu1 %vm3531_vm2, %v3530_v7 }
 0x478   : > { %3253 = vmatprep.subr.mxu1 %v3530_v7 }
 0x47a   : > { %v1505_v26 = vpop.permute.xlu1 %1504 }
 0x545   : > { %v1162_v20 = vpop.f32.mrb[4].mxu1 }
 0x546   : > { %v3232_v21 = vpop.f32.mrb[5].mxu1  ;;  %v1244_v22 = vsel %vm1090_vm3, %v1162_v20, -inf }
 0x547   : > { %1245 = vmax.xlane.f32.xlu0 %v1244_v22 }
 0x549   : > { %v1240_v23 = vpop.f32.mrb[6].mxu1 }
 0x54a   : > { %v3237_v24 = vpop.f32.mrb[7].mxu1  ;;  %v1247_v25 = vsel %vm1090_vm3, %v1240_v23, -inf }
 0x54b   : > { %1248 = vmax.xlane.f32.xlu1 %v1247_v25 }
 0x55c   : > { %1502 = vrot.lane.b32.xlu1 %v3788_v63, %s3534_s26 }
 0x55d   : > { %1426 = vrot.lane.b32.xlu0 %v3799_v12, %s3533_s27  ;;  %s4100_s27 = sld [smem:[#allocation6_spill]] }
 0x560   : > { %1682 = vrot.lane.b32.xlu1 %v3762_v46, %s3535_s18 }
 0x561   : > { %1424 = vrot.lane.b32.xlu0 %v3790_v0, %s3534_s26  ;;  %s3542_s26 = smov 8  }
 0x564   : > { %1840 = vrot.lane.b32.xlu1 %v3804_v15, %s3536_s0 }
 0x565   : > { %1606 = vrot.lane.b32.xlu0 %v3764_v48, %s3535_s18  ;;  %s3543_s18 = smov 16  }
 0x5d4   : > { %v1246_v27 = vpop.xlane.xlu0 %1245 }
 0x5d5   : > { %v1250_v28 = vsub.f32 %v1162_v20, %v1246_v27 }
 0x5d7   : > { %v1252_v29 = vmul.f32 1.442695, %v1250_v28 }
 0x5d8   : > { %v1249_v30 = vpop.xlane.xlu1 %1248  ;;  %v1427_v33 = vpop.permute.xlu0 %1426 }
 0x5d9   : > { %3442 = vpow2.f32 %v1252_v29  ;;  %v1251_v31 = vsub.f32 %v1240_v23, %v1249_v30 }
 0x5db   : > { %v1254_v32 = vmul.f32 1.442695, %v1251_v31 }
 0x5dc   : > { %v1425_v34 = vpop.permute.xlu0 %1424  ;;  %v1503_v36 = vpop.permute.xlu1 %1502 }
 0x5dd   : > { %3444 = vpow2.f32 %v1254_v32 }
 0x5e0   : > { %v1607_v38 = vpop.permute.xlu0 %1606  ;;  %v1683_v39 = vpop.permute.xlu1 %1682 }
 0x5e3   : > { %v3834_v35 = vpop.eup %3442 }
 0x5e4   : > { %3241 = vmatmul.mubr.msk.f32.vlgmr.msra.gmra.mrb[2].mxu0 %vm1090_vm3, %v3834_v35  ;;  %v1841_v52 = vpop.permute.xlu1 %1840 }
 0x5e5   : > { %3249 = vmatpush3.xpose.msk.msra.mxu0 %vm1090_vm3, %v1427_v33  ;;  %3250 = vmatprep.mubr.msk.f32.mxu0 %vm3531_vm2, %v3530_v7 }
 0x5e6   : > { %3258 = vmatprep.subr.mxu0 %v3530_v7 }
 0x5e7   : > { %v3842_v37 = vpop.eup %3444 }
 0x5e8   : > { %3246 = vmatmul.mubr.msk.f32.vlgmr.msra.gmra.mrb[8].mxu1 %vm1090_vm3, %v3842_v37  ;;  %3251 = vmatmul.mubr.msk.f32.vlgmr.msra.gmra.mrb[4].mxu0 %vm1090_vm3, %v1425_v34 }
 0x5e9   : > { %3254 = vmatpush3.xpose.msk.msra.mxu1 %vm1090_vm3, %v1505_v26  ;;  %3259 = vmatpush3.msra.mxu0 %v1607_v38 }
 0x5ea   : > { %3255 = vmatprep.mubr.msk.f32.mxu1 %vm3531_vm2, %v3530_v7  ;;  %3263 = vmatprep.subr.mxu1 %v3530_v7 }
 0x5eb   : > { %3260 = vmatprep.mubr.msk.f32.mxu0 %vm3531_vm2, %v3530_v7  ;;  %3268 = vmatprep.subr.mxu0 %v3530_v7 }
 0x5ec   : > { %3256 = vmatmul.mubr.msk.f32.vlgmr.msra.gmra.mrb[10].mxu1 %vm1090_vm3, %v1503_v36 }
 0x5ed   : > { %3264 = vmatpush3.msra.mxu1 %v1683_v39  ;;  %3265 = vmatprep.mubr.msk.f32.mxu1 %vm3531_vm2, %v3530_v7 }
 0x5ee   : > { %3273 = vmatprep.subr.mxu1 %v3530_v7 }
 0x6b7   : > { %v3858_v40 = vpop.f32.mrb[2].mxu0 }
 0x6b8   : > { %v3242_v41 = vpop.f32.mrb[3].mxu0 }
 0x6bb   : > { %v3860_v42 = vpop.f32.mrb[8].mxu1  ;;  %v1498_v43 = vpop.f32.mrb[4].mxu0 }
 0x6bc   : > { %v3247_v44 = vpop.f32.mrb[9].mxu1  ;;  %v3252_v45 = vpop.f32.mrb[5].mxu0  ;;  %v1580_v47 = vsel %vm1090_vm3, %v1498_v43, -inf }
 0x6bd   : > { %1581 = vmax.xlane.f32.xlu0 %v1580_v47 }
 0x6bf   : > { %v1576_v49 = vpop.f32.mrb[10].mxu1 }
 0x6c0   : > { %v3257_v50 = vpop.f32.mrb[11].mxu1  ;;  %v1583_v51 = vsel %vm1090_vm3, %v1576_v49, -inf }
 0x6c1   : > { %1584 = vmax.xlane.f32.xlu1 %v1583_v51 }
 0x6d2   : > { %1838 = vrot.lane.b32.xlu1 %v3788_v63, %s3537_s17 }
 0x6d3   : > { %1762 = vrot.lane.b32.xlu0 %v3799_v12, %s3536_s0  ;;  %s3544_s0 = smov 24  }
 0x6d6   : > { %2018 = vrot.lane.b32.xlu1 %v3762_v46, %s3538_s19 }
 0x6d7   : > { %1760 = vrot.lane.b32.xlu0 %v3790_v0, %s3537_s17 }
 0x6da   : > { %2176 = vrot.lane.b32.xlu1 %v3804_v15, %s3539_s21 }
 0x6db   : > { %1942 = vrot.lane.b32.xlu0 %v3764_v48, %s3538_s19  ;;  %s4103_s19 = sld [smem:[#allocation13_spill]] (!%p3112_p5) }
 0x74a   : > { %v1582_v53 = vpop.xlane.xlu0 %1581 }
 0x74b   : > { %v1586_v54 = vsub.f32 %v1498_v43, %v1582_v53 }
 0x74d   : > { %v1588_v55 = vmul.f32 1.442695, %v1586_v54 }
 0x74e   : > { %v1585_v56 = vpop.xlane.xlu1 %1584  ;;  %v1763_v59 = vpop.permute.xlu0 %1762 }
 0x74f   : > { %3446 = vpow2.f32 %v1588_v55  ;;  %v1587_v57 = vsub.f32 %v1576_v49, %v1585_v56  ;;  %v1256_v55 = vsel %vm1090_vm3, %v3834_v35, 0.0 }
 0x751   : > { %v1590_v58 = vmul.f32 1.442695, %v1587_v57  ;;  %v1259_v57 = vsel %vm1090_vm3, %v3842_v37, 0.0 }
 0x752   : > { %v1761_v60 = vpop.permute.xlu0 %1760  ;;  %v1839_v62 = vpop.permute.xlu1 %1838 }
 0x753   : > { %3448 = vpow2.f32 %v1590_v58 }
 0x756   : > { %v1943_v4 = vpop.permute.xlu0 %1942  ;;  %v2019_v5 = vpop.permute.xlu1 %2018 }
 0x759   : > { %v3872_v61 = vpop.eup %3446 }
 0x75a   : > { %3261 = vmatmul.mubr.msk.f32.vlgmr.msra.gmra.mrb[6].mxu0 %vm1090_vm3, %v3872_v61  ;;  %v2177_v18 = vpop.permute.xlu1 %2176 }
 0x75b   : > { %3269 = vmatpush3.xpose.msk.msra.mxu0 %vm1090_vm3, %v1763_v59  ;;  %3270 = vmatprep.mubr.msk.f32.mxu0 %vm3531_vm2, %v3530_v7 }
 0x75c   : > { %3278 = vmatprep.subr.mxu0 %v3530_v7 }
 0x75d   : > { %v3880_v1 = vpop.eup %3448 }
 0x75e   : > { %3266 = vmatmul.mubr.msk.f32.vlgmr.msra.gmra.mrb[12].mxu1 %vm1090_vm3, %v3880_v1  ;;  %3271 = vmatmul.mubr.msk.f32.vlgmr.msra.gmra.mrb[8].mxu0 %vm1090_vm3, %v1761_v60  ;;  %v1595_v41 = vsel %vm1090_vm3, %v3880_v1, 0.0 }
 0x75f   : > { %3274 = vmatpush3.xpose.msk.msra.mxu1 %vm1090_vm3, %v1841_v52  ;;  %3279 = vmatpush3.msra.mxu0 %v1943_v4 }
 0x760   : > { %3275 = vmatprep.mubr.msk.f32.mxu1 %vm3531_vm2, %v3530_v7  ;;  %3283 = vmatprep.subr.mxu1 %v3530_v7 }
 0x761   : > { %3280 = vmatprep.mubr.msk.f32.mxu0 %vm3531_vm2, %v3530_v7  ;;  %3288 = vmatprep.subr.mxu0 %v3530_v7 }
 0x762   : > { %3276 = vmatmul.mubr.msk.f32.vlgmr.msra.gmra.mrb[14].mxu1 %vm1090_vm3, %v1839_v62 }
 0x763   : > { %3284 = vmatpush3.msra.mxu1 %v2019_v5  ;;  %3285 = vmatprep.mubr.msk.f32.mxu1 %vm3531_vm2, %v3530_v7 }
 0x764   : > { %3293 = vmatprep.subr.mxu1 %v3530_v7 }
 0x82d   : > { %v3896_v6 = vpop.f32.mrb[6].mxu0 }
 0x82e   : > { %v3262_v8 = vpop.f32.mrb[7].mxu0 }
 0x831   : > { %v3898_v9 = vpop.f32.mrb[12].mxu1  ;;  %v1834_v10 = vpop.f32.mrb[8].mxu0 }
 0x832   : > { %v3267_v11 = vpop.f32.mrb[13].mxu1  ;;  %v3272_v13 = vpop.f32.mrb[9].mxu0  ;;  %v1916_v14 = vsel %vm1090_vm3, %v1834_v10, -inf }
 0x833   : > { %1917 = vmax.xlane.f32.xlu0 %v1916_v14 }
 0x835   : > { %v1912_v15 = vpop.f32.mrb[14].mxu1 }
 0x836   : > { %v3277_v16 = vpop.f32.mrb[15].mxu1  ;;  %v1919_v17 = vsel %vm1090_vm3, %v1912_v15, -inf }
 0x837   : > { %1920 = vmax.xlane.f32.xlu1 %v1919_v17 }
 0x848   : > { %2174 = vrot.lane.b32.xlu1 %v3788_v63, %s3540_s20 }
 0x849   : > { %2098 = vrot.lane.b32.xlu0 %v3799_v12, %s3539_s21  ;;  %s4101_s21 = scalar_lea.vmem %s4066_s9, %s3654_s29 }
 0x84d   : > { %2096 = vrot.lane.b32.xlu0 %v3790_v0, %s3540_s20 }
 0x8c0   : > { %v1918_v19 = vpop.xlane.xlu0 %1917 }
 0x8c1   : > { %v1922_v20 = vsub.f32 %v1834_v10, %v1918_v19 }
 0x8c3   : > { %v1924_v21 = vmul.f32 1.442695, %v1922_v20 }
 0x8c4   : > { %v1921_v22 = vpop.xlane.xlu1 %1920  ;;  %v2099_v25 = vpop.permute.xlu0 %2098 }
 0x8c5   : > { %3450 = vpow2.f32 %v1924_v21  ;;  %v1923_v23 = vsub.f32 %v1912_v15, %v1921_v22 }
 0x8c7   : > { %v1926_v24 = vmul.f32 1.442695, %v1923_v23  ;;  %v2464_v23 = vld [vmem:[%s4100_s27] sm:$0xff] }
 0x8c8   : > { %v2097_v0 = vpop.permute.xlu0 %2096  ;;  %v2175_v12 = vpop.permute.xlu1 %2174 }
 0x8c9   : > { %3452 = vpow2.f32 %v1926_v24  ;;  %v2465_v24 = vld [vmem:[%s4100_s27 + $0x8] sm:$0xff] }
 0x8cf   : > { %v3451_v26 = vpop.eup %3450 }
 0x8d0   : > { %3281 = vmatmul.mubr.msk.f32.vlgmr.msra.gmra.mrb[10].mxu0 %vm1090_vm3, %v3451_v26  ;;  %v1928_v39 = vsel %vm1090_vm3, %v3451_v26, 0.0 }
 0x8d1   : > { %3289 = vmatpush3.xpose.msk.msra.mxu0 %vm1090_vm3, %v2099_v25  ;;  %3290 = vmatprep.mubr.msk.f32.mxu0 %vm3531_vm2, %v3530_v7  ;;  %v3373_v25 = vpack.c.bf16 %v2465_v24, %v2464_v23  ;;  %v2602_v24 = vld [vmem:[%s3694_s6] sm:$0xff] }
 0x8d2   : > { %3298 = vmatprep.subr.mxu0 %v3530_v7 }
 0x8d3   : > { %v3453_v63 = vpop.eup %3452 }
 0x8d4   : > { %3286 = vmatmul.mubr.msk.f32.vlgmr.msra.gmra.mrb[16].mxu1 %vm1090_vm3, %v3453_v63  ;;  %3291 = vmatmul.mubr.msk.f32.vlgmr.msra.gmra.mrb[12].mxu0 %vm1090_vm3, %v2097_v0  ;;  %v1931_v43 = vsel %vm1090_vm3, %v3453_v63, 0.0  ;;  %v2466_v0 = vld [vmem:[%s4100_s27 + $0x10] sm:$0xff] }
 0x8d5   : > { %3294 = vmatpush3.xpose.msk.msra.mxu1 %vm1090_vm3, %v2177_v18  ;;  %3295 = vmatprep.mubr.msk.f32.mxu1 %vm3531_vm2, %v3530_v7 }
 0x8d6   : > { %3303 = vmatprep.subr.mxu1 %v3530_v7  ;;  %3300 = vmatprep.mubr.msk.f32.mxu0 %vm3531_vm2, %v3530_v7 }
 0x8d8   : > { %3296 = vmatmul.mubr.msk.f32.vlgmr.msra.gmra.mrb[18].mxu1 %vm1090_vm3, %v2175_v12  ;;  %v2467_v12 = vld [vmem:[%s4100_s27 + $0x18] sm:$0xff] }
 0x8d9   : > { %3305 = vmatprep.mubr.msk.f32.mxu1 %vm3531_vm2, %v3530_v7  ;;  %v1592_v7 = vsel %vm1090_vm3, %v3872_v61, 0.0 }
 0x9a3   : > { %v3922_v27 = vpop.f32.mrb[10].mxu0 }
 0x9a4   : > { %v3282_v28 = vpop.f32.mrb[11].mxu0 }
 0x9a5   : > { %v3377_v28 = vpack.c.bf16 %v2467_v12, %v2466_v0 }
 0x9a7   : > { %v3924_v29 = vpop.f32.mrb[16].mxu1  ;;  %v2170_v30 = vpop.f32.mrb[12].mxu0 }
 0x9a8   : > { %v3287_v31 = vpop.f32.mrb[17].mxu1  ;;  %v3292_v32 = vpop.f32.mrb[13].mxu0  ;;  %v2252_v33 = vsel %vm1090_vm3, %v2170_v30, -inf }
 0x9a9   : > { %2253 = vmax.xlane.f32.xlu0 %v2252_v33 }
 0x9ab   : > { %v2248_v34 = vpop.f32.mrb[18].mxu1 }
 0x9ac   : > { %v3297_v36 = vpop.f32.mrb[19].mxu1  ;;  %v2255_v38 = vsel %vm1090_vm3, %v2248_v34, -inf }
 0x9ad   : > { %2256 = vmax.xlane.f32.xlu1 %v2255_v38 }
 0x9be   : > { %2354 = vrot.lane.b32.xlu1 %v3762_v46, %s3541_s23 }
 0x9bf   : > { %2278 = vrot.lane.b32.xlu0 %v3764_v48, %s3541_s23 }
 0x9de   : > { %1593 = vadd.xlane.f32.xlu0 %v1592_v7 }
 0x9e2   : > { %1929 = vadd.xlane.f32.xlu0 %v1928_v39  ;;  %1596 = vadd.xlane.f32.xlu1 %v1595_v41 }
 0x9e6   : > { %1932 = vadd.xlane.f32.xlu0 %v1931_v43 }
 0xa36   : > { %v2254_v44 = vpop.xlane.xlu0 %2253 }
 0xa37   : > { %v2258_v45 = vsub.f32 %v2170_v30, %v2254_v44 }
 0xa39   : > { %v2260_v47 = vmul.f32 1.442695, %v2258_v45 }
 0xa3a   : > { %v2279_v46 = vpop.permute.xlu0 %2278  ;;  %v2257_v49 = vpop.xlane.xlu1 %2256 }
 0xa3b   : > { %3454 = vpow2.f32 %v2260_v47  ;;  %v2259_v48 = vsub.f32 %v2248_v34, %v2257_v49  ;;  %3299 = vmatpush3.msra.mxu0 %v2279_v46 }
 0xa3c   : > { %3374 = vmatprep.subr.bf16.mxu0 %v3373_v25 }
 0xa3d   : > { %v2262_v50 = vmul.f32 1.442695, %v2259_v48 }
 0xa3e   : > { %v2355_v51 = vpop.permute.xlu1 %2354 }
 0xa3f   : > { %3456 = vpow2.f32 %v2262_v50  ;;  %3304 = vmatpush3.msra.mxu1 %v2355_v51 }
 0xa45   : > { %v3455_v52 = vpop.eup %3454 }
 0xa46   : > { %3301 = vmatmul.mubr.msk.f32.vlgmr.msra.gmra.mrb[14].mxu0 %vm1090_vm3, %v3455_v52  ;;  %v2264_v53 = vsel %vm1090_vm3, %v3455_v52, 0.0 }
 0xa47   : > { %2265 = vadd.xlane.f32.xlu0 %v2264_v53  ;;  %3376 = vmatpush3.bf16.msra.mxu0 %v3373_v25  ;;  %v2603_v25 = vld [vmem:[%s3694_s6 + $0x8] sm:$0xff] }
 0xa48   : > { %3378 = vmatprep.subr.bf16.mxu0 %v3377_v28 }
 0xa49   : > { %v3457_v54 = vpop.eup %3456 }
 0xa4a   : > { %3306 = vmatmul.mubr.msk.f32.vlgmr.msra.gmra.mrb[20].mxu1 %vm1090_vm3, %v3457_v54  ;;  %v2267_v56 = vsel %vm1090_vm3, %v3457_v54, 0.0 }
 0xa4b   : > { %1257 = vadd.xlane.f32.xlu0 %v1256_v55  ;;  %2268 = vadd.xlane.f32.xlu1 %v2267_v56 }
 0xa4c   : > { %3380 = vmatpush3.bf16.msra.mxu0 %v3377_v28 }
 0xa4f   : > { %1260 = vadd.xlane.f32.xlu1 %v1259_v57 }
 0xa6b   : > { %v1594_v58 = vpop.xlane.xlu0 %1593 }
 0xa6c   : > { %3458 = vrcp.f32 %v1594_v58 }
 0xa6f   : > { %v1930_v59 = vpop.xlane.xlu0 %1929  ;;  %v1597_v60 = vpop.xlane.xlu1 %1596 }
 0xa70   : > { %3460 = vrcp.f32 %v1930_v59 }
 0xa71   : > { %3462 = vrcp.f32 %v1597_v60 }
 0xa73   : > { %v1933_v61 = vpop.xlane.xlu0 %1932 }
 0xa74   : > { %3464 = vrcp.f32 %v1933_v61 }
 0xa76   : > { %v3459_v62 = vpop.eup %3458 }
 0xa77   : > { %v1600_v1 = vmul.f32 %v3459_v62, %v1594_v58 }
 0xa79   : > { %v1602_v4 = vsub.f32 2.0, %v1600_v1 }
 0xa7a   : > { %v3461_v35 = vpop.eup %3460 }
 0xa7b   : > { %v3463_v5 = vpop.eup %3462  ;;  %v1604_v8 = vmul.f32 %v3459_v62, %v1602_v4  ;;  %v1936_v10 = vmul.f32 %v3461_v35, %v1930_v59 }
 0xa7c   : > { %v1601_v11 = vmul.f32 %v3463_v5, %v1597_v60 }
 0xa7d   : > { %v1758_v13 = vmul.f32 %v3896_v6, %v1604_v8  ;;  %v1938_v14 = vsub.f32 2.0, %v1936_v10 }
 0xa7e   : > { %v3465_v37 = vpop.eup %3464  ;;  %v1603_v15 = vsub.f32 2.0, %v1601_v11 }
 0xa7f   : > { %v1937_v16 = vmul.f32 %v3465_v37, %v1933_v61  ;;  %2434 = vrot.lane.b32.xlu0 %v1758_v13, %s3542_s26  ;;  %v1940_v18 = vmul.f32 %v3461_v35, %v1938_v14 }
 0xa80   : > { %v1605_v17 = vmul.f32 %v3463_v5, %v1603_v15 }
 0xa81   : > { %v1939_v19 = vsub.f32 2.0, %v1937_v16  ;;  %v2094_v6 = vmul.f32 %v3922_v27, %v1940_v18 }
 0xa82   : > { %v1759_v20 = vmul.f32 %v3898_v9, %v1605_v17 }
 0xa83   : > { %v1941_v21 = vmul.f32 %v3465_v37, %v1939_v19 }
 0xa84   : > { %2436 = vrot.lane.b32.xlu1 %v1759_v20, %s3542_s26 }
 0xa85   : > { %v2095_v22 = vmul.f32 %v3924_v29, %v1941_v21 }
 0xa88   : > { %2442 = vrot.lane.b32.xlu1 %v2094_v6, %s3543_s18 }
 0xa8c   : > { %2444 = vrot.lane.b32.xlu1 %v2095_v22, %s3543_s18  ;;  %s4102_s18 = sld [smem:[#allocation12_spill]] (!%p3112_p5) }
 0xad4   : > { %v2266_v26 = vpop.xlane.xlu0 %2265 }
 0xad5   : > { %3466 = vrcp.f32 %v2266_v26 }
 0xad8   : > { %v2269_v9 = vpop.xlane.xlu1 %2268  ;;  %v1258_v44 = vpop.xlane.xlu0 %1257 }
 0xad9   : > { %3468 = vrcp.f32 %v2269_v9 }
 0xada   : > { %3470 = vrcp.f32 %v1258_v44 }
 0xadc   : > { %v1261_v45 = vpop.xlane.xlu1 %1260 }
 0xadd   : > { %3472 = vrcp.f32 %v1261_v45 }
 0xadf   : > { %v3467_v63 = vpop.eup %3466 }
 0xae0   : > { %v2272_v27 = vmul.f32 %v3467_v63, %v2266_v26  ;;  %v3381_v26 = vpack.c.bf16 %v2603_v25, %v2602_v24 }
 0xae2   : > { %v2274_v31 = vsub.f32 2.0, %v2272_v27  ;;  %3382 = vmatprep.subr.bf16.mxu1 %v3381_v26 }
 0xae3   : > { %v3469_v30 = vpop.eup %3468  ;;  %3384 = vmatpush3.bf16.msra.mxu1 %v3381_v26 }
 0xae4   : > { %v2273_v29 = vmul.f32 %v3469_v30, %v2269_v9  ;;  %v2276_v33 = vmul.f32 %v3467_v63, %v2274_v31  ;;  %v3471_v47 = vpop.eup %3470  ;;  %v2604_v9 = vld [vmem:[%s3694_s6 + $0x10] sm:$0xff]  ;;  %v2605_v63 = vld [vmem:[%s3694_s6 + $0x18] sm:$0xff] }
 0xae5   : > { %v1264_v46 = vmul.f32 %v3471_v47, %v1258_v44  ;;  %v3385_v0 = vpack.c.bf16 %v2605_v63, %v2604_v9 }
 0xae6   : > { %v2275_v32 = vsub.f32 2.0, %v2273_v29 }
 0xae7   : > { %v3473_v49 = vpop.eup %3472  ;;  %v1266_v50 = vsub.f32 2.0, %v1264_v46  ;;  %3386 = vmatprep.subr.bf16.mxu1 %v3385_v0 }
 0xae8   : > { %v2277_v7 = vmul.f32 %v3469_v30, %v2275_v32  ;;  %v1265_v51 = vmul.f32 %v3473_v49, %v1261_v45  ;;  %3388 = vmatpush3.bf16.msra.mxu1 %v3385_v0  ;;  %v2748_v45 = vld [vmem:[%s3704_s1] sm:$0xff] }
 0xae9   : > { %v1268_v52 = vmul.f32 %v3471_v47, %v1266_v50  ;;  %v2749_v47 = vld [vmem:[%s3704_s1 + $0x8] sm:$0xff] }
 0xaea   : > { %v1267_v53 = vsub.f32 2.0, %v1265_v51  ;;  %v3389_v46 = vpack.c.bf16 %v2749_v47, %v2748_v45  ;;  %v2752_v51 = vld [vmem:[%s3704_s1 + $0x20] sm:$0xff] }
 0xaeb   : > { %v1422_v57 = vmul.f32 %v3858_v40, %v1268_v52  ;;  %v3101_v40 = vld [vmem:[%s4101_s21] ss:$0 sm:$0xff]  ;;  %v2753_v52 = vld [vmem:[%s3704_s1 + $0x28] sm:$0xff] }
 0xaec   : > { %v1269_v56 = vmul.f32 %v3473_v49, %v1267_v53  ;;  %3390 = vmatprep.subr.bf16.mxu0 %v3389_v46  ;;  %v2750_v49 = vld [vmem:[%s3704_s1 + $0x10] sm:$0xff]  ;;  %v3397_v53 = vpack.c.bf16 %v2753_v52, %v2752_v51 }
 0xaee   : > { %v1423_v62 = vmul.f32 %v3860_v42, %v1269_v56 }
 0xaf1   : > { %v2435_v55 = vpop.permute.xlu0 %2434 }
 0xaf2   : > { %v2456_v58 = vsel %vm1090_vm3, %v1422_v57, %v2435_v55  ;;  %v2755_v55 = vld [vmem:[%s3704_s1 + $0x38] sm:$0xff]  ;;  %v3106_v57 = vld [vmem:[%s725_s8] ss:$0 sm:$0xff] }
 0xaf6   : > { %v2437_v48 = vpop.permute.xlu1 %2436 }
 0xaf7   : > { %v2457_v4 = vsel %vm1090_vm3, %v1423_v62, %v2437_v48  ;;  %v2751_v48 = vld [vmem:[%s3704_s1 + $0x18] sm:$0xff] }
 0xaf8   : > { %v3393_v50 = vpack.c.bf16 %v2751_v48, %v2750_v49 }
 0xafa   : > { %v2443_v54 = vpop.permute.xlu1 %2442 }
 0xafb   : > { %v2459_v59 = vsel %vm2458_vm4, %v2456_v58, %v2443_v54  ;;  %v2754_v54 = vld [vmem:[%s3704_s1 + $0x30] sm:$0xff] }
 0xafc   : > { %v3401_v56 = vpack.c.bf16 %v2755_v55, %v2754_v54 }
 0xafe   : > { %v2445_v60 = vpop.permute.xlu1 %2444 }
 0xaff   : > { %v2460_v35 = vsel %vm2458_vm4, %v2457_v4, %v2445_v60 }
 0xb19   : > { %v2350_v34 = vpop.f32.mrb[14].mxu0 }
 0xb1a   : > { %v2430_v36 = vmul.f32 %v2350_v34, %v2276_v33  ;;  %v3302_v38 = vpop.f32.mrb[15].mxu0  ;;  %v3104_v33 = vld [vmem:[%s714_s16] ss:$0 sm:$0xff] }
 0xb1c   : > { %2450 = vrot.lane.b32.xlu0 %v2430_v36, %s3544_s0  ;;  %v3105_v36 = vld [vmem:[%s717_s24] ss:$0 sm:$0xff] }
 0xb1d   : > { %v2426_v39 = vpop.f32.mrb[20].mxu1 }
 0xb1e   : > { %v2431_v41 = vmul.f32 %v2426_v39, %v2277_v7  ;;  %v3307_v43 = vpop.f32.mrb[21].mxu1 }
 0xb20   : > { %2452 = vrot.lane.b32.xlu1 %v2431_v41, %s3544_s0 }
 0xb8e   : > { %v2451_v61 = vpop.permute.xlu0 %2450 }
 0xb8f   : > { %v2462_v1 = vsel %vm2461_vm5, %v2459_v59, %v2451_v61 }
 0xb90   : > { %3316 = vmatprep.mubr.msk.f32.mxu0 %vm747_vm1, %v2462_v1 }
 0xb92   : > { %v2453_v5 = vpop.permute.xlu1 %2452 }
 0xb93   : > { %v2463_v8 = vsel %vm2461_vm5, %v2460_v35, %v2453_v5 }
 0xb94   : > { %3317 = vmatmul.mubr.msk.f32.vlgmr.msra.gmra.mrb[16].mxu0 %vm747_vm1, %v2463_v8 }
 0xb95   : > { %3392 = vmatpush3.bf16.msra.mxu0 %v3389_v46 }
 0xb96   : > { %3394 = vmatprep.subr.bf16.mxu0 %v3393_v50 }
 0xb99   : > { %3396 = vmatpush3.bf16.msra.mxu0 %v3393_v50  ;;  %v3109_v50 = vld [vmem:[%s733_s2] ss:$0 sm:$0xff] }
 0xb9a   : > { %3398 = vmatprep.subr.bf16.mxu0 %v3397_v53 }
 0xb9d   : > { %3400 = vmatpush3.bf16.msra.mxu0 %v3397_v53 }
 0xb9e   : > { %3402 = vmatprep.subr.bf16.mxu0 %v3401_v56 }
 0xba1   : > { %3404 = vmatpush3.bf16.msra.mxu0 %v3401_v56 }
 0xc67   : > { %v3318_v10 = vpop.f32.mrb[16].mxu0 }
 0xc68   : > { %v2553_v11 = vadd.f32 %v3318_v10, %v3101_v40  ;;  %v2547_v13 = vpop.f32.mrb[17].mxu0 }
 0xc69   : > { %v2548_v37 = vadd.f32 %v3101_v40, %v2547_v13 }
 0xc6a   : > { %v3966_v42 = vadd.f32 %v2553_v11, %v3719_v3 }
 0xc6b   : > { %v3969_v14 = vadd.f32 %v2548_v37, %v3717_v2 }
 0xc6c   : > { %v2563_v15 = vsel %vm747_vm1, %v3966_v42, 0.0 }
 0xc6d   : > { %2564 = vadd.xlane.f32.xlu1 %v2563_v15  ;;  %v2560_v16 = vsel %vm747_vm1, %v3969_v14, 0.0 }
 0xc6e   : > { %2561 = vadd.xlane.f32.xlu0 %v2560_v16 }
 0xcfa   : > { %v2565_v17 = vpop.xlane.xlu1 %2564 }
 0xcfb   : > { %v2567_v18 = vmul.f32 0.03125, %v2565_v17  ;;  %v2562_v19 = vpop.xlane.xlu0 %2561 }
 0xcfc   : > { %v2566_v3 = vmul.f32 0.03125, %v2562_v19 }
 0xcfd   : > { %v2569_v20 = vsub.f32 %v3966_v42, %v2567_v18 }
 0xcfe   : > { %v2568_v2 = vsub.f32 %v3969_v14, %v2566_v3 }
 0xcff   : > { %v2571_v22 = vmul.f32 %v2569_v20, %v2569_v20 }
 0xd00   : > { %v2570_v21 = vmul.f32 %v2568_v2, %v2568_v2 }
 0xd01   : > { %v2575_v23 = vsel %vm747_vm1, %v2571_v22, 0.0 }
 0xd02   : > { %v2572_v6 = vsel %vm747_vm1, %v2570_v21, 0.0 }
 0xd03   : > { %2573 = vadd.xlane.f32.xlu0 %v2572_v6 }
 0xd07   : > { %2576 = vadd.xlane.f32.xlu0 %v2575_v23 }
 0xd90   : > { %v2574_v12 = vpop.xlane.xlu0 %2573 }
 0xd91   : > { %v2578_v28 = vmul.f32 0.03125, %v2574_v12 }
 0xd93   : > { %v2580_v27 = vadd.f32 1e-12, %v2578_v28 }
 0xd94   : > { %v2577_v30 = vpop.xlane.xlu0 %2576 }
 0xd95   : > { %3474 = vrsqrt.f32 %v2580_v27  ;;  %v2579_v31 = vmul.f32 0.03125, %v2577_v30 }
 0xd97   : > { %v2581_v29 = vadd.f32 1e-12, %v2579_v31 }
 0xd99   : > { %3476 = vrsqrt.f32 %v2581_v29 }
 0xd9f   : > { %v3475_v32 = vpop.eup %3474 }
 0xda0   : > { %v2584_v34 = vmul.f32 %v3475_v32, %v2568_v2 }
 0xda2   : > { %v2592_v38 = vmul.f32 %v3104_v33, %v2584_v34 }
 0xda3   : > { %v3477_v7 = vpop.eup %3476 }
 0xda4   : > { %v2585_v39 = vmul.f32 %v3477_v7, %v2569_v20  ;;  %v2600_v41 = vadd.f32 %v3105_v36, %v2592_v38 }
 0xda6   : > { %v2593_v43 = vmul.f32 %v3104_v33, %v2585_v39  ;;  %3327 = vmatprep.mubr.msk.f32.mxu1 %vm747_vm1, %v2600_v41 }
 0xda8   : > { %v2601_v44 = vadd.f32 %v3105_v36, %v2593_v43 }
 0xdaa   : > { %3328 = vmatmul.mubr.msk.f32.vlgmr.msra.gmra.mrb[22].mxu1 %vm747_vm1, %v2601_v44 }
 0xe7d   : > { %v3329_v58 = vpop.f32.mrb[22].mxu1 }
 0xe7e   : > { %v2691_v59 = vadd.f32 %v3329_v58, %v3106_v57  ;;  %v2685_v60 = vpop.f32.mrb[23].mxu1 }
 0xe7f   : > { %v2686_v61 = vadd.f32 %v3106_v57, %v2685_v60 }
 0xe80   : > { %v2697_v62 = vmul.f32 0.70710677, %v2691_v59  ;;  %v2695_v46 = vmul.f32 0.5, %v2691_v59 }
 0xe81   : > { %v2696_v1 = vmul.f32 0.70710677, %v2686_v61  ;;  %v2694_v45 = vmul.f32 0.5, %v2686_v61 }
 0xe82   : > { %v2699_v4 = vand.u32 2147483647, %v2697_v62  ;;  %vm2739_vm6 = vcmp.ge.f32.partialorder %v2697_v62, 0.0 }
 0xe83   : > { %v2698_v35 = vand.u32 2147483647, %v2696_v1  ;;  %vm2738_vm7 = vcmp.ge.f32.partialorder %v2696_v1, 0.0 }
 0xe84   : > { %v2701_v5 = vmul.f32 0.3275911, %v2699_v4  ;;  %v2727_v11 = vsub.f32 0.0, %v2699_v4 }
 0xe85   : > { %v2700_v8 = vmul.f32 0.3275911, %v2698_v35  ;;  %v2726_v13 = vsub.f32 0.0, %v2698_v35 }
 0xe86   : > { %v2703_v40 = vadd.f32 1.0, %v2701_v5  ;;  %v2729_v15 = vmul.f32 %v2727_v11, %v2699_v4 }
 0xe87   : > { %v2702_v10 = vadd.f32 1.0, %v2700_v8  ;;  %v2728_v18 = vmul.f32 %v2726_v13, %v2698_v35 }
 0xe88   : > { %3478 = vrcp.f32 %v2703_v40  ;;  %v2732_v20 = vmul.f32 1.442695, %v2729_v15 }
 0xe89   : > { %3480 = vrcp.f32 %v2702_v10  ;;  %v2730_v6 = vmul.f32 1.442695, %v2728_v18  ;;  %v3114_v18 = vld [vmem:[%s4103_s19] ss:$0 sm:$0xff] (!%p3112_p5) }
 0xe8a   : > { %3482 = vpow2.f32 %v2732_v20 }
 0xe8b   : > { %3484 = vpow2.f32 %v2730_v6 }
 0xe92   : > { %v3479_v37 = vpop.eup %3478 }
 0xe93   : > { %v3481_v16 = vpop.eup %3480  ;;  %v2709_v17 = vmul.f32 1.0614054, %v3479_v37 }
 0xe94   : > { %v2708_v19 = vmul.f32 1.0614054, %v3481_v16  ;;  %v3483_v31 = vpop.eup %3482 }
 0xe95   : > { %v2711_v3 = vadd.f32 -1.4531521, %v2709_v17  ;;  %v3485_v32 = vpop.eup %3484 }
 0xe96   : > { %v2710_v2 = vadd.f32 -1.4531521, %v2708_v19 }
 0xe97   : > { %v2713_v21 = vmul.f32 %v3479_v37, %v2711_v3 }
 0xe98   : > { %v2712_v22 = vmul.f32 %v3481_v16, %v2710_v2 }
 0xe99   : > { %v2715_v23 = vadd.f32 1.4214138, %v2713_v21 }
 0xe9a   : > { %v2714_v24 = vadd.f32 1.4214138, %v2712_v22 }
 0xe9b   : > { %v2717_v25 = vmul.f32 %v3479_v37, %v2715_v23 }
 0xe9c   : > { %v2716_v26 = vmul.f32 %v3481_v16, %v2714_v24 }
 0xe9d   : > { %v2719_v9 = vadd.f32 -0.28449672, %v2717_v25 }
 0xe9e   : > { %v2718_v63 = vadd.f32 -0.28449672, %v2716_v26 }
 0xe9f   : > { %v2721_v0 = vmul.f32 %v3479_v37, %v2719_v9 }
 0xea0   : > { %v2720_v12 = vmul.f32 %v3481_v16, %v2718_v63 }
 0xea1   : > { %v2723_v28 = vadd.f32 0.2548296, %v2721_v0 }
 0xea2   : > { %v2722_v27 = vadd.f32 0.2548296, %v2720_v12 }
 0xea3   : > { %v2725_v30 = vmul.f32 %v3479_v37, %v2723_v28 }
 0xea4   : > { %v2724_v29 = vmul.f32 %v3481_v16, %v2722_v27  ;;  %v3113_v16 = vld [vmem:[%s4102_s18] ss:$0 sm:$0xff] (!%p3112_p5) }
 0xea5   : > { %v2735_v33 = vmul.f32 %v3483_v31, %v2725_v30 }
 0xea6   : > { %v2734_v34 = vmul.f32 %v3485_v32, %v2724_v29 }
 0xea7   : > { %v2737_v36 = vsub.f32 1.0, %v2735_v33 }
 0xea8   : > { %v2736_v38 = vsub.f32 1.0, %v2734_v34 }
 0xea9   : > { %v2741_v7 = vsub.f32 0.0, %v2737_v36 }
 0xeaa   : > { %v2740_v39 = vsub.f32 0.0, %v2736_v38 }
 0xeab   : > { %v2743_v41 = vsel %vm2739_vm6, %v2737_v36, %v2741_v7 }
 0xeac   : > { %v2745_v43 = vadd.f32 1.0, %v2743_v41  ;;  %v2742_v44 = vsel %vm2738_vm7, %v2736_v38, %v2740_v39 }
 0xead   : > { %v2744_v47 = vadd.f32 1.0, %v2742_v44 }
 0xeae   : > { %v2747_v48 = vmul.f32 %v2745_v43, %v2695_v46 }
 0xeaf   : > { %v2746_v49 = vmul.f32 %v2744_v47, %v2694_v45 }
 0xeb1   : > { %3346 = vmatprep.mubr.msk.f32.mxu0 %vm2763_vm8, %v2746_v49 }
 0xeb2   : > { %3347 = vmatmul.mubr.msk.f32.vlgmr.msra.gmra.mrb[18].mxu0 %vm2763_vm8, %v2747_v48 }
 0xf85   : > { %v3348_v51 = vpop.f32.mrb[18].mxu0  ;;  %2852 = sbr.rel (%p3112_p5) target bundleno = 4297 (0x10c9), region = 100 }
 0xf86   : > { %v2842_v52 = vadd.f32 %v3348_v51, %v3109_v50  ;;  %v2836_v53 = vpop.f32.mrb[19].mxu0 }
 0xf87   : > { %v2837_v54 = vadd.f32 %v3109_v50, %v2836_v53 }
 0xf88   : > { %v2846_v55 = vadd.f32 %v2842_v52, %v3966_v42 }
 0xf89   : > { %v2845_v56 = vadd.f32 %v2837_v54, %v3969_v14 }
 0xf8a   : > { %2848 = vst.msk [vmem:[#allocation2 + $0x8] sm:$0xff] %vm747_vm1, %v2846_v55  ;;  %v2858_v58 = vsel (!%p3112_p5), %vm747_vm1, %v2846_v55, 0.0 }
 0xf8b   : > { %2847 = vst.msk [vmem:[#allocation2] sm:$0xff] %vm747_vm1, %v2845_v56  ;;  %v2855_v57 = vsel (!%p3112_p5), %vm747_vm1, %v2845_v56, 0.0 }
 0xf8c   : > { %2856 = vadd.xlane.f32.xlu0 %v2855_v57 }
 0xf90   : > { %2859 = vadd.xlane.f32.xlu0 %v2858_v58 }
0x1019   : > { %v2857_v59 = vpop.xlane.xlu0 %2856 }
0x101a   : > { %v2861_v60 = vmul.f32 0.03125, %v2857_v59 }
0x101c   : > { %v2863_v61 = vsub.f32 %v2845_v56, %v2861_v60 }
0x101d   : > { %v2860_v62 = vpop.xlane.xlu0 %2859 }
0x101e   : > { %v2862_v42 = vmul.f32 0.03125, %v2860_v62  ;;  %v2865_v1 = vmul.f32 %v2863_v61, %v2863_v61 }
0x1020   : > { %v2864_v14 = vsub.f32 %v2846_v55, %v2862_v42  ;;  %v2867_v4 = vsel %vm747_vm1, %v2865_v1, 0.0 }
0x1021   : > { %2868 = vadd.xlane.f32.xlu1 %v2867_v4 }
0x1022   : > { %v2866_v35 = vmul.f32 %v2864_v14, %v2864_v14 }
0x1024   : > { %v2870_v5 = vsel %vm747_vm1, %v2866_v35, 0.0 }
0x1025   : > { %2871 = vadd.xlane.f32.xlu1 %v2870_v5 }
0x10ae   : > { %v2869_v8 = vpop.xlane.xlu1 %2868 }
0x10af   : > { %v2873_v40 = vmul.f32 0.03125, %v2869_v8 }
0x10b1   : > { %v2875_v10 = vadd.f32 1e-12, %v2873_v40 }
0x10b2   : > { %v2872_v11 = vpop.xlane.xlu1 %2871 }
0x10b3   : > { %3486 = vrsqrt.f32 %v2875_v10  ;;  %v2874_v13 = vmul.f32 0.03125, %v2872_v11 }
0x10b5   : > { %v2876_v37 = vadd.f32 1e-12, %v2874_v13 }
0x10b7   : > { %3488 = vrsqrt.f32 %v2876_v37 }
0x10bd   : > { %v3487_v15 = vpop.eup %3486 }
0x10be   : > { %v2879_v17 = vmul.f32 %v3487_v15, %v2863_v61 }
0x10c0   : > { %v2887_v19 = vmul.f32 %v3113_v16, %v2879_v17 }
0x10c1   : > { %v3489_v3 = vpop.eup %3488 }
0x10c2   : > { %v2895_v20 = vadd.f32 %v3114_v18, %v2887_v19  ;;  %v2880_v2 = vmul.f32 %v3489_v3, %v2864_v14 }
0x10c4   : > { %2897 = vst.msk [vmem:[#allocation2] sm:$0xff] %vm747_vm1, %v2895_v20  ;;  %v2888_v21 = vmul.f32 %v3113_v16, %v2880_v2 }
0x10c6   : > { %v2896_v6 = vadd.f32 %v3114_v18, %v2888_v21 }
0x10c8   : > { %2898 = vst.msk [vmem:[#allocation2 + $0x8] sm:$0xff] %vm747_vm1, %v2896_v6 }
0x10c9 PF: > { %p3409_p6 = scmp.eq.s32.totalorder %s3648_s28, 1  ;;  %s3545_s21 = smov [#allocation2]  }
0x10ca   : > { %s2905_s20 = sshll.u32 %s3545_s21, 4  ;;  %s2906_s20 = int_to_ptr.vmem [resolvable:$true] %s2905_s20 }
0x10cb   : > { %s3490_s23 = scalar_lea.vmem %s2906_s20, 256  ;;  %p3497_p10 = scmp.lt.s32.totalorder %s2906_s20, %s2906_s20 }
0x10cc   : > { %p3491_p7 = scmp.ne.s32.totalorder %s2906_s20, %s3490_s23  ;;  %p3498_p11 = scmp.lt.s32.totalorder %s3490_s23, %s3490_s23 }
0x10ce   : > { %p3492_p8 = pnand %p3491_p7, %p3409_p6  ;;  %p3499_p12 = por %p3498_p11, %p3497_p10 }
0x10d0   : > { %p3493_p9 = pneg %p3492_p8 }
0x10d2   : > { %p3500_p13 = pnand %p3499_p12, %p3493_p9 }
0x10d4   : > { %3503 = shalt.err (!%p3500_p13)
}
0x10d5   : > { %s4104_s16 = sld [smem:[#allocation14_spill]] }
0x10db   : > { %s3504_s24 = scalar_lea.hbm %s4104_s16, 256 }
0x10dc   : > { %p3505_p0 = scmp.ne.s32.totalorder %s4104_s16, %s3504_s24  ;;  %p3510_p3 = scmp.lt.u32.totalorder %s3504_s24, %s4104_s16 }
0x10de   : > { %p3506_p1 = pnand %p3505_p0, %p3409_p6 }
0x10e0   : > { %p3507_p2 = pneg %p3506_p1 }
0x10e2   : > { %p3512_p4 = pnand %p3510_p3, %p3507_p2 }
0x10e4   : > { %3515 = shalt.err (!%p3512_p4)
}
0x10e5   : > { %s3546_s18 = smov 128  }
0x10e6   : > { %3406 = dma.vmem_to_hbm [thread:$0]  (%p3409_p6), %s2906_s20, 256, %s4104_s16, [#allocation3], %s3546_s18, %s3546_s18, %s3542_s26  }
0x10e7   : > { %3521 = dma.done.wait (%p3409_p6), [#allocation3], 256  }
0x10e8   : > { %3523 = vsyncadd (%p3409_p6), [#allocation3], 4294967040 }
0x10e9 PF: > { %s4105_s19 = sld [smem:[#allocation5_spill]] }
0x10ef   : > { %s29_s27 = sadd.s32 1, %s4105_s19  }
0x10f0   : > { %p26_p5 = scmp.ge.s32.totalorder %s29_s27, 4  }
0x10f2   :  { %28 = sbr.rel (!%p26_p5) target bundleno = 10 (0xa), region = 160 }
0x10f9   :  { %2921 = vsyncpa [#allocation3], 1 }
0x10fa   :  { %2923 = vsyncpa [#allocation3 + $0x1], 1 }

</bundles_post_ra>
